<compile_context>
chip_gen: v6e
topology: v6e:2x2x1
jax: 0.10.0
libtpu: 0.0.40
codegen_flags: <defaults>
</compile_context>

<pallas_src>
import math
import functools

import jax
import jax.numpy as jnp
from jax.experimental import pallas as pl
from jax.experimental.pallas import tpu as pltpu


def _eq_conv2d_kernel(x_ref, w_ref, b_ref, o_ref, *, K, Wp, M):
    """One batch element: K*K per-tap matmuls contracting over channels.

    x_ref: ((Hp+1)*Wp, Cin)  zero-padded flat NHWC image (+1 zero guard row)
    w_ref: (K*K, Cin, Cout)  tap weights, equalized-LR scale folded in
    b_ref: (1, Cout)         f32 bias
    o_ref: (M, Cout)         M = Ho*Wp full-width output rows (Wo..Wp-1 cols
                             are throwaway and dropped in the wrapper)
    """
    acc = jnp.zeros(o_ref.shape, jnp.float32)
    # Contiguous chain of dots into one f32 accumulator (MRB accumulate on
    # v7x).  Tap slices start at static sublane offsets kh*Wp+kw; the shifted
    # loads are minor next to the dots (profile before "fixing" alignment).
    for kh in range(K):
        for kw in range(K):
            a = x_ref[pl.ds(kh * Wp + kw, M), :]            # (M, Cin)
            acc = acc + jnp.dot(a, w_ref[kh * K + kw],      # (Cin, Cout)
                                preferred_element_type=jnp.float32)
    o_ref[...] = (acc + b_ref[...]).astype(o_ref.dtype)


def equalized_conv2d(x_nchw, weight_oihw, bias, padding=0, compute_dtype=None):
    """Forward pass of EqualizedConv2d (stride=1, dilation=1, groups=1).

    x_nchw: (N, Cin, H, W); weight_oihw: (Cout, Cin, K, K); bias: (Cout,).
    compute_dtype: dtype fed to the MXU (e.g. jnp.bfloat16); accumulation is
    always f32 and the output keeps x's dtype.
    """
    N, Cin, H, W = x_nchw.shape
    Cout, Cin_w, K, K2 = weight_oihw.shape
    assert Cin_w == Cin and K == K2
    out_dtype = x_nchw.dtype
    if compute_dtype is None:
        compute_dtype = out_dtype

    Hp, Wp = H + 2 * padding, W + 2 * padding
    Ho, Wo = Hp - K + 1, Wp - K + 1
    assert Ho >= 1 and Wo >= 1
    M = Ho * Wp
    c_scale = 1.0 / math.sqrt(Cin * K * K)

    # ---- wrapper-side layout (interface-mandated) --------------------------
    # NCHW -> NHWC, zero-pad (fused by XLA into the same relayout pass; one
    # extra bottom zero row keeps the last tap slice in bounds), flatten to
    # ((Hp+1)*Wp, Cin) rows with channels in lanes.
    x = jnp.transpose(x_nchw, (0, 2, 3, 1))
    x = jnp.pad(x, ((0, 0), (padding, padding + 1), (padding, padding), (0, 0)))
    x = x.reshape(N, (Hp + 1) * Wp, Cin).astype(compute_dtype)

    # (Cout, Cin, K, K) -> (K*K, Cin, Cout); equalized-LR scale folded in (f32
    # math, single rounding into compute_dtype).  Exact K*K*Cin*Cout weight —
    # no Toeplitz replication.
    w = weight_oihw.astype(jnp.float32) * jnp.float32(c_scale)
    w = jnp.transpose(w, (2, 3, 1, 0)).reshape(K * K, Cin, Cout).astype(compute_dtype)

    b2d = bias.astype(jnp.float32).reshape(1, Cout)   # added in f32 epilogue

    kernel = functools.partial(_eq_conv2d_kernel, K=K, Wp=Wp, M=M)

    out = pl.pallas_call(
        kernel,
        out_shape=jax.ShapeDtypeStruct((N, M, Cout), out_dtype),
        grid=(N,),
        in_specs=[
            # batch dim squeezed out of the kernel view
            pl.BlockSpec((None, (Hp + 1) * Wp, Cin), lambda n: (n, 0, 0)),
            # grid-invariant weight / bias (constant index_map -> fetched once)
            pl.BlockSpec((K * K, Cin, Cout), lambda n: (0, 0, 0)),
            pl.BlockSpec((1, Cout), lambda n: (0, 0)),
        ],
        out_specs=pl.BlockSpec((None, M, Cout), lambda n: (n, 0, 0)),
        compiler_params=pltpu.CompilerParams(
            dimension_semantics=("parallel",),       # 1 batch elem per v7x TC
            vmem_limit_bytes=48 * 1024 * 1024,       # explicit budget (v7x: 64 MiB phys)
        ),
    )(x, w, b2d)

    # (N, Ho*Wp, Cout) -> (N, Ho, Wp, Cout) -> drop throwaway cols -> NCHW.
    out = out.reshape(N, Ho, Wp, Cout)[:, :, :Wo, :]
    return jnp.transpose(out, (0, 3, 1, 2))


def _reference(x_nchw, weight_oihw, bias, padding):
    Cin, K = weight_oihw.shape[1], weight_oihw.shape[2]
    c = 1.0 / math.sqrt(Cin * K * K)
    out = jax.lax.conv_general_dilated(
        x_nchw, weight_oihw * c,
        window_strides=(1, 1),
        padding=[(padding, padding), (padding, padding)],
        dimension_numbers=("NCHW", "OIHW", "NCHW"))
    return out + bias[None, :, None, None]


if __name__ == "__main__":
    # Module config: in_features=4, out_features=8, kernel_size=3, padding=1
    N, Cin, H, W = 2, 4, 16, 16
    Cout, K, padding = 8, 3, 1

    key = jax.random.PRNGKey(0)
    kx, kw = jax.random.split(key)
    x = jax.random.normal(kx, (N, Cin, H, W), dtype=jnp.float32)
    # EqualizedWeight: weight ~ randn([Cout, Cin, K, K]) (scale applied in forward)
    weight = jax.random.normal(kw, (Cout, Cin, K, K), dtype=jnp.float32)
    # bias = ones(out_features)
    bias = jnp.ones((Cout,), dtype=jnp.float32)

    ref = jax.block_until_ready(_reference(x, weight, bias, padding))

    # f32 operand path: strict check against the f32 reference.
    out = jax.block_until_ready(equalized_conv2d(x, weight, bias, padding=padding))
    assert out.shape == (N, Cout, H, W), out.shape
    assert jnp.allclose(out, ref, rtol=1e-4, atol=1e-4), float(
        jnp.max(jnp.abs(out - ref)))

    # bf16 MXU-operand path (f32 accumulation): looser tolerance per review.
    out_bf16 = jax.block_until_ready(
        equalized_conv2d(x, weight, bias, padding=padding,
                         compute_dtype=jnp.bfloat16))
    assert jnp.allclose(out_bf16, ref, rtol=5e-2, atol=5e-2), float(
        jnp.max(jnp.abs(out_bf16 - ref)))

    print("KERNEL_OK")
</pallas_src>

<mosaic_0001>
module attributes {stable_mosaic.version = 11 : i64} {
  func.func @_eq_conv2d_kernel(%arg0: i32, %arg1: memref<1x342x4xf32, #tpu.memory_space<vmem>>, %arg2: memref<9x4x8xf32, #tpu.memory_space<vmem>>, %arg3: memref<1x8xf32, #tpu.memory_space<vmem>>, %arg4: memref<1x288x8xf32, #tpu.memory_space<vmem>>) attributes {dimension_semantics = [#tpu.dimension_semantics<parallel>], iteration_bounds = array<i64: 2>, scalar_prefetch = 0 : i64, scratch_operands = 0 : i64, tpu.core_type = #tpu.core_type<tc>, window_params = [{transform_indices = @transform_0, window_bounds = array<i64: 1, 342, 4>}, {pipeline_mode = #tpu.pipeline_mode<synchronous>, transform_indices = @transform_1, window_bounds = array<i64: 9, 4, 8>}, {pipeline_mode = #tpu.pipeline_mode<synchronous>, transform_indices = @transform_2, window_bounds = array<i64: 1, 8>}, {transform_indices = @transform_3, window_bounds = array<i64: 1, 288, 8>}]} {
    %cst = arith.constant 0.000000e+00 : f32
    %0 = vector.broadcast %cst : f32 to vector<288x8xf32>
    %c0 = arith.constant 0 : index
    %c0_0 = arith.constant 0 : index
    %c0_1 = arith.constant 0 : index
    %1 = vector.load %arg1[%c0, %c0_0, %c0_1] : memref<1x342x4xf32, #tpu.memory_space<vmem>>, vector<1x288x4xf32>
    %2 = vector.shape_cast %1 : vector<1x288x4xf32> to vector<288x4xf32>
    %c0_2 = arith.constant 0 : index
    %c0_3 = arith.constant 0 : index
    %c0_4 = arith.constant 0 : index
    %3 = vector.load %arg2[%c0_2, %c0_3, %c0_4] : memref<9x4x8xf32, #tpu.memory_space<vmem>>, vector<1x4x8xf32>
    %4 = vector.shape_cast %3 : vector<1x4x8xf32> to vector<4x8xf32>
    %cst_5 = arith.constant dense<0.000000e+00> : vector<288x8xf32>
    %5 = tpu.matmul %2, %4, %cst_5 {dimension_numbers = #tpu.dot_dimension_numbers<[1], [0], [0], [1], [0, 0, 1, 1], [], []>} : vector<288x4xf32>, vector<4x8xf32>, vector<288x8xf32> -> vector<288x8xf32>
    %6 = arith.addf %0, %5 : vector<288x8xf32>
    %c0_6 = arith.constant 0 : index
    %c1 = arith.constant 1 : index
    %c0_7 = arith.constant 0 : index
    %7 = vector.load %arg1[%c0_6, %c1, %c0_7] : memref<1x342x4xf32, #tpu.memory_space<vmem>>, vector<1x288x4xf32>
    %8 = vector.shape_cast %7 : vector<1x288x4xf32> to vector<288x4xf32>
    %c1_8 = arith.constant 1 : index
    %c0_9 = arith.constant 0 : index
    %c0_10 = arith.constant 0 : index
    %9 = vector.load %arg2[%c1_8, %c0_9, %c0_10] : memref<9x4x8xf32, #tpu.memory_space<vmem>>, vector<1x4x8xf32>
    %10 = vector.shape_cast %9 : vector<1x4x8xf32> to vector<4x8xf32>
    %cst_11 = arith.constant dense<0.000000e+00> : vector<288x8xf32>
    %11 = tpu.matmul %8, %10, %cst_11 {dimension_numbers = #tpu.dot_dimension_numbers<[1], [0], [0], [1], [0, 0, 1, 1], [], []>} : vector<288x4xf32>, vector<4x8xf32>, vector<288x8xf32> -> vector<288x8xf32>
    %12 = arith.addf %6, %11 : vector<288x8xf32>
    %c0_12 = arith.constant 0 : index
    %c2 = arith.constant 2 : index
    %c0_13 = arith.constant 0 : index
    %13 = vector.load %arg1[%c0_12, %c2, %c0_13] : memref<1x342x4xf32, #tpu.memory_space<vmem>>, vector<1x288x4xf32>
    %14 = vector.shape_cast %13 : vector<1x288x4xf32> to vector<288x4xf32>
    %c2_14 = arith.constant 2 : index
    %c0_15 = arith.constant 0 : index
    %c0_16 = arith.constant 0 : index
    %15 = vector.load %arg2[%c2_14, %c0_15, %c0_16] : memref<9x4x8xf32, #tpu.memory_space<vmem>>, vector<1x4x8xf32>
    %16 = vector.shape_cast %15 : vector<1x4x8xf32> to vector<4x8xf32>
    %cst_17 = arith.constant dense<0.000000e+00> : vector<288x8xf32>
    %17 = tpu.matmul %14, %16, %cst_17 {dimension_numbers = #tpu.dot_dimension_numbers<[1], [0], [0], [1], [0, 0, 1, 1], [], []>} : vector<288x4xf32>, vector<4x8xf32>, vector<288x8xf32> -> vector<288x8xf32>
    %18 = arith.addf %12, %17 : vector<288x8xf32>
    %c0_18 = arith.constant 0 : index
    %c18 = arith.constant 18 : index
    %c0_19 = arith.constant 0 : index
    %19 = vector.load %arg1[%c0_18, %c18, %c0_19] : memref<1x342x4xf32, #tpu.memory_space<vmem>>, vector<1x288x4xf32>
    %20 = vector.shape_cast %19 : vector<1x288x4xf32> to vector<288x4xf32>
    %c3 = arith.constant 3 : index
    %c0_20 = arith.constant 0 : index
    %c0_21 = arith.constant 0 : index
    %21 = vector.load %arg2[%c3, %c0_20, %c0_21] : memref<9x4x8xf32, #tpu.memory_space<vmem>>, vector<1x4x8xf32>
    %22 = vector.shape_cast %21 : vector<1x4x8xf32> to vector<4x8xf32>
    %cst_22 = arith.constant dense<0.000000e+00> : vector<288x8xf32>
    %23 = tpu.matmul %20, %22, %cst_22 {dimension_numbers = #tpu.dot_dimension_numbers<[1], [0], [0], [1], [0, 0, 1, 1], [], []>} : vector<288x4xf32>, vector<4x8xf32>, vector<288x8xf32> -> vector<288x8xf32>
    %24 = arith.addf %18, %23 : vector<288x8xf32>
    %c0_23 = arith.constant 0 : index
    %c19 = arith.constant 19 : index
    %c0_24 = arith.constant 0 : index
    %25 = vector.load %arg1[%c0_23, %c19, %c0_24] : memref<1x342x4xf32, #tpu.memory_space<vmem>>, vector<1x288x4xf32>
    %26 = vector.shape_cast %25 : vector<1x288x4xf32> to vector<288x4xf32>
    %c4 = arith.constant 4 : index
    %c0_25 = arith.constant 0 : index
    %c0_26 = arith.constant 0 : index
    %27 = vector.load %arg2[%c4, %c0_25, %c0_26] : memref<9x4x8xf32, #tpu.memory_space<vmem>>, vector<1x4x8xf32>
    %28 = vector.shape_cast %27 : vector<1x4x8xf32> to vector<4x8xf32>
    %cst_27 = arith.constant dense<0.000000e+00> : vector<288x8xf32>
    %29 = tpu.matmul %26, %28, %cst_27 {dimension_numbers = #tpu.dot_dimension_numbers<[1], [0], [0], [1], [0, 0, 1, 1], [], []>} : vector<288x4xf32>, vector<4x8xf32>, vector<288x8xf32> -> vector<288x8xf32>
    %30 = arith.addf %24, %29 : vector<288x8xf32>
    %c0_28 = arith.constant 0 : index
    %c20 = arith.constant 20 : index
    %c0_29 = arith.constant 0 : index
    %31 = vector.load %arg1[%c0_28, %c20, %c0_29] : memref<1x342x4xf32, #tpu.memory_space<vmem>>, vector<1x288x4xf32>
    %32 = vector.shape_cast %31 : vector<1x288x4xf32> to vector<288x4xf32>
    %c5 = arith.constant 5 : index
    %c0_30 = arith.constant 0 : index
    %c0_31 = arith.constant 0 : index
    %33 = vector.load %arg2[%c5, %c0_30, %c0_31] : memref<9x4x8xf32, #tpu.memory_space<vmem>>, vector<1x4x8xf32>
    %34 = vector.shape_cast %33 : vector<1x4x8xf32> to vector<4x8xf32>
    %cst_32 = arith.constant dense<0.000000e+00> : vector<288x8xf32>
    %35 = tpu.matmul %32, %34, %cst_32 {dimension_numbers = #tpu.dot_dimension_numbers<[1], [0], [0], [1], [0, 0, 1, 1], [], []>} : vector<288x4xf32>, vector<4x8xf32>, vector<288x8xf32> -> vector<288x8xf32>
    %36 = arith.addf %30, %35 : vector<288x8xf32>
    %c0_33 = arith.constant 0 : index
    %c36 = arith.constant 36 : index
    %c0_34 = arith.constant 0 : index
    %37 = vector.load %arg1[%c0_33, %c36, %c0_34] : memref<1x342x4xf32, #tpu.memory_space<vmem>>, vector<1x288x4xf32>
    %38 = vector.shape_cast %37 : vector<1x288x4xf32> to vector<288x4xf32>
    %c6 = arith.constant 6 : index
    %c0_35 = arith.constant 0 : index
    %c0_36 = arith.constant 0 : index
    %39 = vector.load %arg2[%c6, %c0_35, %c0_36] : memref<9x4x8xf32, #tpu.memory_space<vmem>>, vector<1x4x8xf32>
    %40 = vector.shape_cast %39 : vector<1x4x8xf32> to vector<4x8xf32>
    %cst_37 = arith.constant dense<0.000000e+00> : vector<288x8xf32>
    %41 = tpu.matmul %38, %40, %cst_37 {dimension_numbers = #tpu.dot_dimension_numbers<[1], [0], [0], [1], [0, 0, 1, 1], [], []>} : vector<288x4xf32>, vector<4x8xf32>, vector<288x8xf32> -> vector<288x8xf32>
    %42 = arith.addf %36, %41 : vector<288x8xf32>
    %c0_38 = arith.constant 0 : index
    %c37 = arith.constant 37 : index
    %c0_39 = arith.constant 0 : index
    %43 = vector.load %arg1[%c0_38, %c37, %c0_39] : memref<1x342x4xf32, #tpu.memory_space<vmem>>, vector<1x288x4xf32>
    %44 = vector.shape_cast %43 : vector<1x288x4xf32> to vector<288x4xf32>
    %c7 = arith.constant 7 : index
    %c0_40 = arith.constant 0 : index
    %c0_41 = arith.constant 0 : index
    %45 = vector.load %arg2[%c7, %c0_40, %c0_41] : memref<9x4x8xf32, #tpu.memory_space<vmem>>, vector<1x4x8xf32>
    %46 = vector.shape_cast %45 : vector<1x4x8xf32> to vector<4x8xf32>
    %cst_42 = arith.constant dense<0.000000e+00> : vector<288x8xf32>
    %47 = tpu.matmul %44, %46, %cst_42 {dimension_numbers = #tpu.dot_dimension_numbers<[1], [0], [0], [1], [0, 0, 1, 1], [], []>} : vector<288x4xf32>, vector<4x8xf32>, vector<288x8xf32> -> vector<288x8xf32>
    %48 = arith.addf %42, %47 : vector<288x8xf32>
    %c0_43 = arith.constant 0 : index
    %c38 = arith.constant 38 : index
    %c0_44 = arith.constant 0 : index
    %49 = vector.load %arg1[%c0_43, %c38, %c0_44] : memref<1x342x4xf32, #tpu.memory_space<vmem>>, vector<1x288x4xf32>
    %50 = vector.shape_cast %49 : vector<1x288x4xf32> to vector<288x4xf32>
    %c8 = arith.constant 8 : index
    %c0_45 = arith.constant 0 : index
    %c0_46 = arith.constant 0 : index
    %51 = vector.load %arg2[%c8, %c0_45, %c0_46] : memref<9x4x8xf32, #tpu.memory_space<vmem>>, vector<1x4x8xf32>
    %52 = vector.shape_cast %51 : vector<1x4x8xf32> to vector<4x8xf32>
    %cst_47 = arith.constant dense<0.000000e+00> : vector<288x8xf32>
    %53 = tpu.matmul %50, %52, %cst_47 {dimension_numbers = #tpu.dot_dimension_numbers<[1], [0], [0], [1], [0, 0, 1, 1], [], []>} : vector<288x4xf32>, vector<4x8xf32>, vector<288x8xf32> -> vector<288x8xf32>
    %54 = arith.addf %48, %53 : vector<288x8xf32>
    %c0_48 = arith.constant 0 : index
    %c0_49 = arith.constant 0 : index
    %55 = vector.load %arg3[%c0_48, %c0_49] : memref<1x8xf32, #tpu.memory_space<vmem>>, vector<1x8xf32>
    %56 = vector.broadcast %55 : vector<1x8xf32> to vector<288x8xf32>
    %57 = arith.addf %54, %56 : vector<288x8xf32>
    %c0_50 = arith.constant 0 : index
    %c0_51 = arith.constant 0 : index
    %c0_52 = arith.constant 0 : index
    %58 = vector.load %arg4[%c0_50, %c0_51, %c0_52] : memref<1x288x8xf32, #tpu.memory_space<vmem>>, vector<1x288x8xf32>
    %59 = vector.shape_cast %58 : vector<1x288x8xf32> to vector<288x8xf32>
    %60 = vector.shape_cast %57 : vector<288x8xf32> to vector<1x288x8xf32>
    tpu.vector_store %arg4[%c0_50, %c0_51, %c0_52], %60 {strides = array<i32>} : memref<1x288x8xf32, #tpu.memory_space<vmem>>, vector<1x288x8xf32>,
    return
  }
  func.func @transform_0(%arg0: i32) -> (i32, i32, i32) {
    %c0_i32 = arith.constant 0 : i32
    %c0_i32_0 = arith.constant 0 : i32
    %c0_i32_1 = arith.constant 0 : i32
    return %arg0, %c0_i32, %c0_i32_0 : i32, i32, i32
  }
  func.func @transform_1(%arg0: i32) -> (i32, i32, i32) {
    %c0_i32 = arith.constant 0 : i32
    %c0_i32_0 = arith.constant 0 : i32
    %c0_i32_1 = arith.constant 0 : i32
    %c0_i32_2 = arith.constant 0 : i32
    return %c0_i32, %c0_i32_0, %c0_i32_1 : i32, i32, i32
  }
  func.func @transform_2(%arg0: i32) -> (i32, i32) {
    %c0_i32 = arith.constant 0 : i32
    %c0_i32_0 = arith.constant 0 : i32
    %c0_i32_1 = arith.constant 0 : i32
    return %c0_i32, %c0_i32_0 : i32, i32
  }
  func.func @transform_3(%arg0: i32) -> (i32, i32, i32) {
    %c0_i32 = arith.constant 0 : i32
    %c0_i32_0 = arith.constant 0 : i32
    %c0_i32_1 = arith.constant 0 : i32
    return %arg0, %c0_i32, %c0_i32_0 : i32, i32, i32
  }
}

</mosaic_0001>

<bundles_post_ra>
// kernel: tpu_custom_call.1
= control target key start
LH: loop header
LB: loop body
LE: loop exit
PB: predicated region body
PF: predicated region fallthrough
CT: control target
= control target key end

     0   :  { %s5333_s12 = smov 0   ;;  %s6690_s0 = inlined_call_operand.vmem [shape: f32[2,342,4], index: 0, kind: input, shape index: {}]   ;;  %s6691_s1 = inlined_call_operand.vmem [shape: f32[9,4,8], index: 1, kind: input, shape index: {}]   ;;  %s6692_s2 = inlined_call_operand.vmem [shape: f32[1,8], index: 2, kind: input, shape index: {}]   ;;  %s6693_s3 = inlined_call_operand.vmem [shape: f32[2,288,8], index: 3, kind: output, shape index: {}]  }
   0x1 LB: > { %s4105_s13 = sadd.s32 4294967295, %s5311_s12   ;;  %p4109_p0 = scmp.ge.s32.totalorder %s5311_s12, 1  ;;  %s5311_s12 = sphi %s5333_s12, %s13_s12  }
   0x2   : > { %p137_p1 = scmp.lt.s32.totalorder %s5311_s12, 3 }
   0x4   : > { %p138_p2 = pnand %p4109_p0, %p137_p1 }
   0x5   : > { %p161_p3 = scmp.lt.s32.totalorder (!%p138_p2), %s4105_s13, 1 }
   0x6   : > { %141 = sbr.rel (%p138_p2) target bundleno = 539 (0x21b), region = 32 }
   0xb   : > { %v4112_v0 = vld [vmem:[%s6691_s1 + $0x4] sm:$0xf]  ;;  %vm355_vm0 = vcmask 1043456   ;;  %v207_v1 = vld [vmem:[%s6691_s1] sm:$0xf]  ;;  %s6695_s13 = smov (!%p161_p3, %s4105_s13), 1 }
   0xc   : > { %5293 = vmatprep.subr.msk.mxu1 %vm355_vm0, %v4112_v0  ;;  %4789 = vmatprep.subr.msk.mxu0 %vm355_vm0, %v4112_v0  ;;  %v4187_v2 = vld [vmem:[%s6691_s1 + $0x8] sm:$0xf]  ;;  %s5295_s20 = smul.u32 344, %s6695_s13  ;;  %vm246_vm1 = vcmask 31744   ;;  %v5377_v9 = vld [vmem:[%s6691_s1 + $0xc] sm:$0xf] }
   0xd   : > { %5294 = vmatpush3.msk.msra.mxu1 %vm355_vm0, %v4112_v0  ;;  %4790 = vmatpush3.msk.msra.mxu0 %vm355_vm0, %v4112_v0  ;;  %v5382_v10 = vld [vmem:[%s6691_s1 + $0x10] sm:$0xf]  ;;  %v5467_v47 = vld [vmem:[%s6691_s1 + $0x14] sm:$0xf]  ;;  %v5472_v48 = vld [vmem:[%s6691_s1 + $0x18] sm:$0xf] }
   0xe   : > { %4845 = vmatprep.subr.msk.mxu1 %vm355_vm0, %v207_v1  ;;  %4901 = vmatprep.subr.msk.mxu0 %vm355_vm0, %v4187_v2  ;;  %s5362_s23 = scalar_lea.vmem %s6690_s0, %s5295_s20  ;;  %s5296_s9 = smul.u32 288, %s6695_s13  ;;  %vm4013_vm2 = vcmask 64512  }
   0xf   : > { %v208_v3 = vld [vmem:[%s5362_s23 + $0x1] sm:$0xff]  ;;  %v226_v4 = vld [vmem:[%s5362_s23 + $0x91] sm:$0xff]  ;;  %v209_v5 = vld [vmem:[%s5362_s23 + $0x9] sm:$0xff] }
  0x10   : > { %4791 = vmatprep.mubr.msk.f32.mxu0 %vm246_vm1, %v208_v3  ;;  %4818 = vmatprep.mubr.msk.f32.mxu1 %vm246_vm1, %v226_v4  ;;  %v227_v6 = vld [vmem:[%s5362_s23 + $0x99] sm:$0xff]  ;;  %v210_v7 = vld [vmem:[%s5362_s23 + $0x11] sm:$0xff]  ;;  %v228_v8 = vld [vmem:[%s5362_s23 + $0xa1] sm:$0xff]  ;;  %s6543_s16 = scalar_lea.vmem %s6693_s3, %s5296_s9 }
  0x11   : > { %4792 = vmatmul.mubr.msk.f32.vlgmr.msra.gmra.mxu0 %vm246_vm1, %v209_v5  ;;  %4819 = vmatmul.mubr.msk.f32.vlgmr.msra.gmra.mxu1 %vm246_vm1, %v227_v6  ;;  %v211_v11 = vld [vmem:[%s5362_s23 + $0x19] sm:$0xff]  ;;  %v229_v12 = vld [vmem:[%s5362_s23 + $0xa9] sm:$0xff]  ;;  %v212_v13 = vld [vmem:[%s5362_s23 + $0x21] sm:$0xff] }
  0x12   : > { %4846 = vmatpush3.msk.msra.mxu1 %vm355_vm0, %v207_v1  ;;  %4902 = vmatpush3.msk.msra.mxu0 %vm355_vm0, %v4187_v2  ;;  %v230_v14 = vld [vmem:[%s5362_s23 + $0xb1] sm:$0xff]  ;;  %v213_v15 = vld [vmem:[%s5362_s23 + $0x29] sm:$0xff]  ;;  %v231_v16 = vld [vmem:[%s5362_s23 + $0xb9] sm:$0xff] }
  0x13   : > { %4794 = vmatprep.mubr.msk.f32.mxu0 %vm246_vm1, %v210_v7  ;;  %4821 = vmatprep.mubr.msk.f32.mxu1 %vm246_vm1, %v228_v8  ;;  %v214_v17 = vld [vmem:[%s5362_s23 + $0x31] sm:$0xff]  ;;  %v232_v18 = vld [vmem:[%s5362_s23 + $0xc1] sm:$0xff]  ;;  %v215_v19 = vld [vmem:[%s5362_s23 + $0x39] sm:$0xff] }
  0x14   : > { %4957 = vmatprep.subr.msk.mxu1 %vm355_vm0, %v5377_v9  ;;  %5013 = vmatprep.subr.msk.mxu0 %vm355_vm0, %v5382_v10  ;;  %v233_v20 = vld [vmem:[%s5362_s23 + $0xc9] sm:$0xff]  ;;  %v216_v21 = vld [vmem:[%s5362_s23 + $0x41] sm:$0xff]  ;;  %v234_v22 = vld [vmem:[%s5362_s23 + $0xd1] sm:$0xff] }
  0x15   : > { %4795 = vmatmul.mubr.msk.f32.gmra.mxu0 %vm246_vm1, %v211_v11  ;;  %4822 = vmatmul.mubr.msk.f32.gmra.mxu1 %vm246_vm1, %v229_v12  ;;  %v217_v23 = vld [vmem:[%s5362_s23 + $0x49] sm:$0xff]  ;;  %v235_v24 = vld [vmem:[%s5362_s23 + $0xd9] sm:$0xff]  ;;  %v218_v25 = vld [vmem:[%s5362_s23 + $0x51] sm:$0xff] }
  0x16   : > { %4797 = vmatprep.mubr.msk.f32.mxu0 %vm246_vm1, %v212_v13  ;;  %4824 = vmatprep.mubr.msk.f32.mxu1 %vm246_vm1, %v230_v14  ;;  %v236_v26 = vld [vmem:[%s5362_s23 + $0xe1] sm:$0xff]  ;;  %v219_v27 = vld [vmem:[%s5362_s23 + $0x59] sm:$0xff]  ;;  %v237_v28 = vld [vmem:[%s5362_s23 + $0xe9] sm:$0xff] }
  0x17   : > { %v220_v29 = vld [vmem:[%s5362_s23 + $0x61] sm:$0xff]  ;;  %v238_v30 = vld [vmem:[%s5362_s23 + $0xf1] sm:$0xff]  ;;  %v221_v31 = vld [vmem:[%s5362_s23 + $0x69] sm:$0xff] }
  0x18   : > { %v239_v32 = vld [vmem:[%s5362_s23 + $0xf9] sm:$0xff]  ;;  %v222_v33 = vld [vmem:[%s5362_s23 + $0x71] sm:$0xff]  ;;  %v240_v34 = vld [vmem:[%s5362_s23 + $0x101] sm:$0xff] }
  0x19   : > { %4798 = vmatmul.mubr.msk.f32.gmra.mxu0 %vm246_vm1, %v213_v15  ;;  %4825 = vmatmul.mubr.msk.f32.gmra.mxu1 %vm246_vm1, %v231_v16  ;;  %v223_v35 = vld [vmem:[%s5362_s23 + $0x79] sm:$0xff]  ;;  %v241_v36 = vld [vmem:[%s5362_s23 + $0x109] sm:$0xff]  ;;  %v224_v37 = vld [vmem:[%s5362_s23 + $0x81] sm:$0xff] }
  0x1a   : > { %4800 = vmatprep.mubr.msk.f32.mxu0 %vm246_vm1, %v214_v17  ;;  %4827 = vmatprep.mubr.msk.f32.mxu1 %vm246_vm1, %v232_v18  ;;  %v242_v38 = vld [vmem:[%s5362_s23 + $0x111] sm:$0xff]  ;;  %v225_v39 = vld [vmem:[%s5362_s23 + $0x89] sm:$0xff]  ;;  %v243_v40 = vld [vmem:[%s5362_s23 + $0x119] sm:$0xff] }
  0x1b   : > { %v171_v41 = vld [vmem:[%s5362_s23] sm:$0xff]  ;;  %v172_v43 = vld [vmem:[%s5362_s23 + $0x8] sm:$0xff]  ;;  %v173_v45 = vld [vmem:[%s5362_s23 + $0x10] sm:$0xff] }
  0x1c   : > { %v960_v42 = vld [vmem:[%s5362_s23 + $0x2] sm:$0xff]  ;;  %v961_v44 = vld [vmem:[%s5362_s23 + $0xa] sm:$0xff]  ;;  %v5460_v46 = vld [vmem:[%s5362_s23 + $0x12] sm:$0xff] }
  0x1d   : > { %4801 = vmatmul.mubr.msk.f32.gmra.mxu0 %vm246_vm1, %v215_v19  ;;  %4828 = vmatmul.mubr.msk.f32.gmra.mxu1 %vm246_vm1, %v233_v20  ;;  %v174_v49 = vld [vmem:[%s5362_s23 + $0x18] sm:$0xff]  ;;  %v175_v51 = vld [vmem:[%s5362_s23 + $0x20] sm:$0xff]  ;;  %v176_v53 = vld [vmem:[%s5362_s23 + $0x28] sm:$0xff] }
  0x1e   : > { %4803 = vmatprep.mubr.msk.f32.mxu0 %vm246_vm1, %v216_v21  ;;  %4830 = vmatprep.mubr.msk.f32.mxu1 %vm246_vm1, %v234_v22  ;;  %v5480_v50 = vld [vmem:[%s5362_s23 + $0x1a] sm:$0xff]  ;;  %v5487_v52 = vld [vmem:[%s5362_s23 + $0x22] sm:$0xff]  ;;  %v5501_v54 = vld [vmem:[%s5362_s23 + $0x2a] sm:$0xff] }
  0x1f   : > { %v177_v55 = vld [vmem:[%s5362_s23 + $0x30] sm:$0xff]  ;;  %v178_v57 = vld [vmem:[%s5362_s23 + $0x38] sm:$0xff]  ;;  %v179_v59 = vld [vmem:[%s5362_s23 + $0x40] sm:$0xff] }
  0x20   : > { %v5505_v56 = vld [vmem:[%s5362_s23 + $0x32] sm:$0xff]  ;;  %v5515_v58 = vld [vmem:[%s5362_s23 + $0x3a] sm:$0xff]  ;;  %v5519_v60 = vld [vmem:[%s5362_s23 + $0x42] sm:$0xff] }
  0x21   : > { %4804 = vmatmul.mubr.msk.f32.gmra.mxu0 %vm246_vm1, %v217_v23  ;;  %4831 = vmatmul.mubr.msk.f32.gmra.mxu1 %vm246_vm1, %v235_v24  ;;  %v180_v61 = vld [vmem:[%s5362_s23 + $0x48] sm:$0xff]  ;;  %v181_v63 = vld [vmem:[%s5362_s23 + $0x50] sm:$0xff]  ;;  %v182_v1 = vld [vmem:[%s5362_s23 + $0x58] sm:$0xff] }
  0x22   : > { %4806 = vmatprep.mubr.msk.f32.mxu0 %vm246_vm1, %v218_v25  ;;  %4833 = vmatprep.mubr.msk.f32.mxu1 %vm246_vm1, %v236_v26  ;;  %v5529_v62 = vld [vmem:[%s5362_s23 + $0x4a] sm:$0xff]  ;;  %v5533_v0 = vld [vmem:[%s5362_s23 + $0x52] sm:$0xff]  ;;  %v5543_v2 = vld [vmem:[%s5362_s23 + $0x5a] sm:$0xff] }
  0x23   : > { %v183_v3 = vld [vmem:[%s5362_s23 + $0x60] sm:$0xff]  ;;  %v184_v5 = vld [vmem:[%s5362_s23 + $0x68] sm:$0xff]  ;;  %v185_v7 = vld [vmem:[%s5362_s23 + $0x70] sm:$0xff] }
  0x24   : > { %v5547_v4 = vld [vmem:[%s5362_s23 + $0x62] sm:$0xff]  ;;  %v5557_v6 = vld [vmem:[%s5362_s23 + $0x6a] sm:$0xff]  ;;  %v5561_v8 = vld [vmem:[%s5362_s23 + $0x72] sm:$0xff] }
  0x25   : > { %4807 = vmatmul.mubr.msk.f32.gmra.mxu0 %vm246_vm1, %v219_v27  ;;  %4834 = vmatmul.mubr.msk.f32.gmra.mxu1 %vm246_vm1, %v237_v28  ;;  %v187_v11 = vld [vmem:[%s5362_s23 + $0x80] sm:$0xff]  ;;  %v188_v13 = vld [vmem:[%s5362_s23 + $0x88] sm:$0xff]  ;;  %v189_v15 = vld [vmem:[%s5362_s23 + $0x90] sm:$0xff] }
  0x26   : > { %4809 = vmatprep.mubr.msk.f32.mxu0 %vm246_vm1, %v220_v29  ;;  %4836 = vmatprep.mubr.msk.f32.mxu1 %vm246_vm1, %v238_v30  ;;  %v5575_v12 = vld [vmem:[%s5362_s23 + $0x82] sm:$0xff]  ;;  %v5585_v14 = vld [vmem:[%s5362_s23 + $0x8a] sm:$0xff]  ;;  %v5589_v16 = vld [vmem:[%s5362_s23 + $0x92] sm:$0xff] }
  0x27   : > { %v190_v17 = vld [vmem:[%s5362_s23 + $0x98] sm:$0xff]  ;;  %v191_v19 = vld [vmem:[%s5362_s23 + $0xa0] sm:$0xff]  ;;  %v192_v21 = vld [vmem:[%s5362_s23 + $0xa8] sm:$0xff] }
  0x28   : > { %v5599_v18 = vld [vmem:[%s5362_s23 + $0x9a] sm:$0xff]  ;;  %v5603_v20 = vld [vmem:[%s5362_s23 + $0xa2] sm:$0xff]  ;;  %v5613_v22 = vld [vmem:[%s5362_s23 + $0xaa] sm:$0xff] }
  0x29   : > { %4810 = vmatmul.mubr.msk.f32.gmra.mxu0 %vm246_vm1, %v221_v31  ;;  %4837 = vmatmul.mubr.msk.f32.gmra.mxu1 %vm246_vm1, %v239_v32  ;;  %v193_v23 = vld [vmem:[%s5362_s23 + $0xb0] sm:$0xff]  ;;  %v194_v25 = vld [vmem:[%s5362_s23 + $0xb8] sm:$0xff]  ;;  %v195_v27 = vld [vmem:[%s5362_s23 + $0xc0] sm:$0xff] }
  0x2a   : > { %4812 = vmatprep.mubr.msk.f32.mxu0 %vm246_vm1, %v222_v33  ;;  %4839 = vmatprep.mubr.msk.f32.mxu1 %vm246_vm1, %v240_v34  ;;  %v5617_v24 = vld [vmem:[%s5362_s23 + $0xb2] sm:$0xff]  ;;  %v5627_v26 = vld [vmem:[%s5362_s23 + $0xba] sm:$0xff]  ;;  %v5631_v28 = vld [vmem:[%s5362_s23 + $0xc2] sm:$0xff] }
  0x2b   : > { %v196_v29 = vld [vmem:[%s5362_s23 + $0xc8] sm:$0xff]  ;;  %v197_v31 = vld [vmem:[%s5362_s23 + $0xd0] sm:$0xff]  ;;  %v198_v33 = vld [vmem:[%s5362_s23 + $0xd8] sm:$0xff] }
  0x2c   : > { %v5641_v30 = vld [vmem:[%s5362_s23 + $0xca] sm:$0xff]  ;;  %v5645_v32 = vld [vmem:[%s5362_s23 + $0xd2] sm:$0xff]  ;;  %v5655_v34 = vld [vmem:[%s5362_s23 + $0xda] sm:$0xff] }
  0x2d   : > { %4813 = vmatmul.mubr.msk.f32.gmra.mxu0 %vm246_vm1, %v223_v35  ;;  %4840 = vmatmul.mubr.msk.f32.gmra.mxu1 %vm246_vm1, %v241_v36  ;;  %v199_v35 = vld [vmem:[%s5362_s23 + $0xe0] sm:$0xff] }
  0x2e   : > { %4815 = vmatprep.mubr.msk.f32.mxu0 %vm246_vm1, %v224_v37  ;;  %4842 = vmatprep.mubr.msk.f32.mxu1 %vm246_vm1, %v242_v38  ;;  %v5659_v36 = vld [vmem:[%s5362_s23 + $0xe2] sm:$0xff]  ;;  %v5669_v38 = vld [vmem:[%s5362_s23 + $0xea] sm:$0xff] }
  0x2f   : > { %v200_v37 = vld [vmem:[%s5362_s23 + $0xe8] sm:$0xff] }
  0x31   : > { %4816 = vmatmul.mubr.msk.f32.gmra.mxu0 %vm246_vm1, %v225_v39  ;;  %4843 = vmatmul.mubr.msk.f32.gmra.mxu1 %vm246_vm1, %v243_v40  ;;  %v201_v39 = vld [vmem:[%s5362_s23 + $0xf0] sm:$0xff] }
  0x32   : > { %4847 = vmatprep.mubr.msk.f32.mxu1 %vm246_vm1, %v171_v41  ;;  %4903 = vmatprep.mubr.msk.f32.mxu0 %vm246_vm1, %v960_v42  ;;  %v5673_v40 = vld [vmem:[%s5362_s23 + $0xf2] sm:$0xff]  ;;  %v5683_v42 = vld [vmem:[%s5362_s23 + $0xfa] sm:$0xff] }
  0x33   : > { %v202_v41 = vld [vmem:[%s5362_s23 + $0xf8] sm:$0xff] }
  0x35   : > { %4848 = vmatmul.mubr.msk.f32.vlgmr.msra.gmra.mxu1 %vm246_vm1, %v172_v43  ;;  %4904 = vmatmul.mubr.msk.f32.vlgmr.msra.gmra.mxu0 %vm246_vm1, %v961_v44  ;;  %v203_v43 = vld [vmem:[%s5362_s23 + $0x100] sm:$0xff] }
  0x36   : > { %4958 = vmatpush3.msk.msra.mxu1 %vm355_vm0, %v5377_v9  ;;  %5014 = vmatpush3.msk.msra.mxu0 %vm355_vm0, %v5382_v10  ;;  %v186_v9 = vld [vmem:[%s5362_s23 + $0x78] sm:$0xff]  ;;  %v5687_v44 = vld [vmem:[%s5362_s23 + $0x102] sm:$0xff] }
  0x37   : > { %4850 = vmatprep.mubr.msk.f32.mxu1 %vm246_vm1, %v173_v45  ;;  %4906 = vmatprep.mubr.msk.f32.mxu0 %vm246_vm1, %v5460_v46  ;;  %v5571_v10 = vld [vmem:[%s5362_s23 + $0x7a] sm:$0xff]  ;;  %v204_v45 = vld [vmem:[%s5362_s23 + $0x108] sm:$0xff] }
  0x38   : > { %5069 = vmatprep.subr.msk.mxu1 %vm355_vm0, %v5467_v47  ;;  %5125 = vmatprep.subr.msk.mxu0 %vm355_vm0, %v5472_v48 }
  0x39   : > { %4851 = vmatmul.mubr.msk.f32.gmra.mxu1 %vm246_vm1, %v174_v49  ;;  %4907 = vmatmul.mubr.msk.f32.gmra.mxu0 %vm246_vm1, %v5480_v50  ;;  %v5697_v49 = vld [vmem:[%s5362_s23 + $0x10a] sm:$0xff] }
  0x3a   : > { %4853 = vmatprep.mubr.msk.f32.mxu1 %vm246_vm1, %v175_v51  ;;  %4909 = vmatprep.mubr.msk.f32.mxu0 %vm246_vm1, %v5487_v52  ;;  %v205_v51 = vld [vmem:[%s5362_s23 + $0x110] sm:$0xff] }
  0x3d   : > { %4854 = vmatmul.mubr.msk.f32.gmra.mxu1 %vm246_vm1, %v176_v53  ;;  %4910 = vmatmul.mubr.msk.f32.gmra.mxu0 %vm246_vm1, %v5501_v54  ;;  %v5701_v53 = vld [vmem:[%s5362_s23 + $0x112] sm:$0xff] }
  0x3e   : > { %4856 = vmatprep.mubr.msk.f32.mxu1 %vm246_vm1, %v177_v55  ;;  %4912 = vmatprep.mubr.msk.f32.mxu0 %vm246_vm1, %v5505_v56  ;;  %v206_v55 = vld [vmem:[%s5362_s23 + $0x118] sm:$0xff] }
  0x41   : > { %4857 = vmatmul.mubr.msk.f32.gmra.mxu1 %vm246_vm1, %v178_v57  ;;  %4913 = vmatmul.mubr.msk.f32.gmra.mxu0 %vm246_vm1, %v5515_v58  ;;  %v5711_v57 = vld [vmem:[%s5362_s23 + $0x11a] sm:$0xff] }
  0x42   : > { %4859 = vmatprep.mubr.msk.f32.mxu1 %vm246_vm1, %v179_v59  ;;  %4915 = vmatprep.mubr.msk.f32.mxu0 %vm246_vm1, %v5519_v60  ;;  %v1820_v59 = vld [vmem:[%s5362_s23 + $0x13] sm:$0xff] }
  0x45   : > { %4860 = vmatmul.mubr.msk.f32.gmra.mxu1 %vm246_vm1, %v180_v61  ;;  %4916 = vmatmul.mubr.msk.f32.gmra.mxu0 %vm246_vm1, %v5529_v62  ;;  %v1821_v61 = vld [vmem:[%s5362_s23 + $0x1b] sm:$0xff] }
  0x46   : > { %4862 = vmatprep.mubr.msk.f32.mxu1 %vm246_vm1, %v181_v63  ;;  %4918 = vmatprep.mubr.msk.f32.mxu0 %vm246_vm1, %v5533_v0  ;;  %v1822_v63 = vld [vmem:[%s5362_s23 + $0x23] sm:$0xff] }
  0x49   : > { %4863 = vmatmul.mubr.msk.f32.gmra.mxu1 %vm246_vm1, %v182_v1  ;;  %4919 = vmatmul.mubr.msk.f32.gmra.mxu0 %vm246_vm1, %v5543_v2  ;;  %v5728_v1 = vld [vmem:[%s6691_s1 + $0x1c] sm:$0xf] }
  0x4a   : > { %4865 = vmatprep.mubr.msk.f32.mxu1 %vm246_vm1, %v183_v3  ;;  %4921 = vmatprep.mubr.msk.f32.mxu0 %vm246_vm1, %v5547_v4  ;;  %v1824_v3 = vld [vmem:[%s5362_s23 + $0x33] sm:$0xff] }
  0x4d   : > { %4866 = vmatmul.mubr.msk.f32.gmra.mxu1 %vm246_vm1, %v184_v5  ;;  %4922 = vmatmul.mubr.msk.f32.gmra.mxu0 %vm246_vm1, %v5557_v6  ;;  %v1836_v5 = vld [vmem:[%s5362_s23 + $0x93] sm:$0xff] }
  0x4e   : > { %4868 = vmatprep.mubr.msk.f32.mxu1 %vm246_vm1, %v185_v7  ;;  %4924 = vmatprep.mubr.msk.f32.mxu0 %vm246_vm1, %v5561_v8  ;;  %v1838_v7 = vld [vmem:[%s5362_s23 + $0xa3] sm:$0xff] }
  0x51   : > { %4869 = vmatmul.mubr.msk.f32.gmra.mxu1 %vm246_vm1, %v186_v9  ;;  %4925 = vmatmul.mubr.msk.f32.gmra.mxu0 %vm246_vm1, %v5571_v10  ;;  %v1840_v9 = vld [vmem:[%s5362_s23 + $0xb3] sm:$0xff] }
  0x52   : > { %4871 = vmatprep.mubr.msk.f32.mxu1 %vm246_vm1, %v187_v11  ;;  %4927 = vmatprep.mubr.msk.f32.mxu0 %vm246_vm1, %v5575_v12  ;;  %v1842_v11 = vld [vmem:[%s5362_s23 + $0xc3] sm:$0xff] }
  0x55   : > { %4872 = vmatmul.mubr.msk.f32.gmra.mxu1 %vm246_vm1, %v188_v13  ;;  %4928 = vmatmul.mubr.msk.f32.gmra.mxu0 %vm246_vm1, %v5585_v14  ;;  %v1844_v13 = vld [vmem:[%s5362_s23 + $0xd3] sm:$0xff] }
  0x56   : > { %4874 = vmatprep.mubr.msk.f32.mxu1 %vm246_vm1, %v189_v15  ;;  %4930 = vmatprep.mubr.msk.f32.mxu0 %vm246_vm1, %v5589_v16  ;;  %v1846_v15 = vld [vmem:[%s5362_s23 + $0xe3] sm:$0xff] }
  0x59   : > { %4875 = vmatmul.mubr.msk.f32.gmra.mxu1 %vm246_vm1, %v190_v17  ;;  %4931 = vmatmul.mubr.msk.f32.gmra.mxu0 %vm246_vm1, %v5599_v18  ;;  %v1848_v17 = vld [vmem:[%s5362_s23 + $0xf3] sm:$0xff] }
  0x5a   : > { %4877 = vmatprep.mubr.msk.f32.mxu1 %vm246_vm1, %v191_v19  ;;  %4933 = vmatprep.mubr.msk.f32.mxu0 %vm246_vm1, %v5603_v20  ;;  %v1850_v19 = vld [vmem:[%s5362_s23 + $0x103] sm:$0xff] }
  0x5d   : > { %4878 = vmatmul.mubr.msk.f32.gmra.mxu1 %vm246_vm1, %v192_v21  ;;  %4934 = vmatmul.mubr.msk.f32.gmra.mxu0 %vm246_vm1, %v5613_v22  ;;  %v1852_v21 = vld [vmem:[%s5362_s23 + $0x113] sm:$0xff] }
  0x5e   : > { %4880 = vmatprep.mubr.msk.f32.mxu1 %vm246_vm1, %v193_v23  ;;  %4936 = vmatprep.mubr.msk.f32.mxu0 %vm246_vm1, %v5617_v24  ;;  %v1424_v23 = vld [vmem:[%s5362_s23 + $0x122] sm:$0xff] }
  0x61   : > { %4881 = vmatmul.mubr.msk.f32.gmra.mxu1 %vm246_vm1, %v194_v25  ;;  %4937 = vmatmul.mubr.msk.f32.gmra.mxu0 %vm246_vm1, %v5627_v26  ;;  %v1425_v25 = vld [vmem:[%s5362_s23 + $0x12a] sm:$0xff] }
  0x62   : > { %4883 = vmatprep.mubr.msk.f32.mxu1 %vm246_vm1, %v195_v27  ;;  %4939 = vmatprep.mubr.msk.f32.mxu0 %vm246_vm1, %v5631_v28  ;;  %v2250_v27 = vld [vmem:[%s5362_s23 + $0x14] sm:$0xff] }
  0x65   : > { %4884 = vmatmul.mubr.msk.f32.gmra.mxu1 %vm246_vm1, %v196_v29  ;;  %4940 = vmatmul.mubr.msk.f32.gmra.mxu0 %vm246_vm1, %v5641_v30  ;;  %v2251_v29 = vld [vmem:[%s5362_s23 + $0x1c] sm:$0xff] }
  0x66   : > { %4886 = vmatprep.mubr.msk.f32.mxu1 %vm246_vm1, %v197_v31  ;;  %4942 = vmatprep.mubr.msk.f32.mxu0 %vm246_vm1, %v5645_v32  ;;  %v2682_v31 = vld [vmem:[%s5362_s23 + $0x34] sm:$0xff] }
  0x69   : > { %4887 = vmatmul.mubr.msk.f32.gmra.mxu1 %vm246_vm1, %v198_v33  ;;  %4943 = vmatmul.mubr.msk.f32.gmra.mxu0 %vm246_vm1, %v5655_v34  ;;  %v2684_v33 = vld [vmem:[%s5362_s23 + $0x44] sm:$0xff] }
  0x6a   : > { %4889 = vmatprep.mubr.msk.f32.mxu1 %vm246_vm1, %v199_v35  ;;  %4945 = vmatprep.mubr.msk.f32.mxu0 %vm246_vm1, %v5659_v36  ;;  %v2686_v35 = vld [vmem:[%s5362_s23 + $0x54] sm:$0xff] }
  0x6d   : > { %4890 = vmatmul.mubr.msk.f32.gmra.mxu1 %vm246_vm1, %v200_v37  ;;  %4946 = vmatmul.mubr.msk.f32.gmra.mxu0 %vm246_vm1, %v5669_v38  ;;  %v2688_v37 = vld [vmem:[%s5362_s23 + $0x64] sm:$0xff] }
  0x6e   : > { %4892 = vmatprep.mubr.msk.f32.mxu1 %vm246_vm1, %v201_v39  ;;  %4948 = vmatprep.mubr.msk.f32.mxu0 %vm246_vm1, %v5673_v40 }
  0x71   : > { %4893 = vmatmul.mubr.msk.f32.gmra.mxu1 %vm246_vm1, %v202_v41  ;;  %4949 = vmatmul.mubr.msk.f32.gmra.mxu0 %vm246_vm1, %v5683_v42 }
  0x72   : > { %4895 = vmatprep.mubr.msk.f32.mxu1 %vm246_vm1, %v203_v43  ;;  %4951 = vmatprep.mubr.msk.f32.mxu0 %vm246_vm1, %v5687_v44  ;;  %v2690_v43 = vld [vmem:[%s5362_s23 + $0x74] sm:$0xff] }
  0x75   : > { %4896 = vmatmul.mubr.msk.f32.gmra.mxu1 %vm246_vm1, %v204_v45  ;;  %4952 = vmatmul.mubr.msk.f32.gmra.mxu0 %vm246_vm1, %v5697_v49 }
  0x76   : > { %4898 = vmatprep.mubr.msk.f32.mxu1 %vm246_vm1, %v205_v51  ;;  %4954 = vmatprep.mubr.msk.f32.mxu0 %vm246_vm1, %v5701_v53 }
  0x79   : > { %4899 = vmatmul.mubr.msk.f32.gmra.mxu1 %vm246_vm1, %v206_v55  ;;  %4955 = vmatmul.mubr.msk.f32.gmra.mxu0 %vm246_vm1, %v5711_v57  ;;  %v2692_v55 = vld [vmem:[%s5362_s23 + $0x84] sm:$0xff] }
  0x7a   : > { %4959 = vmatprep.mubr.msk.f32.mxu1 %vm246_vm1, %v5460_v46  ;;  %5015 = vmatprep.mubr.msk.f32.mxu0 %vm246_vm1, %v1820_v59  ;;  %v5733_v46 = vld [vmem:[%s6691_s1 + $0x20] sm:$0xf] }
  0x7d   : > { %4960 = vmatmul.mubr.msk.f32.vlgmr.msra.gmra.mxu1 %vm246_vm1, %v5480_v50  ;;  %5016 = vmatmul.mubr.msk.f32.vlgmr.msra.gmra.mxu0 %vm246_vm1, %v1821_v61  ;;  %v1823_v50 = vld [vmem:[%s5362_s23 + $0x2b] sm:$0xff] }
  0x7e   : > { %5070 = vmatpush3.msk.msra.mxu1 %vm355_vm0, %v5467_v47  ;;  %5126 = vmatpush3.msk.msra.mxu0 %vm355_vm0, %v5472_v48  ;;  %v1825_v47 = vld [vmem:[%s5362_s23 + $0x3b] sm:$0xff]  ;;  %v1826_v48 = vld [vmem:[%s5362_s23 + $0x43] sm:$0xff]  ;;  %v2693_v61 = vld [vmem:[%s5362_s23 + $0x8c] sm:$0xff] }
  0x7f   : > { %4962 = vmatprep.mubr.msk.f32.mxu1 %vm246_vm1, %v5487_v52  ;;  %5018 = vmatprep.mubr.msk.f32.mxu0 %vm246_vm1, %v1822_v63  ;;  %v1827_v52 = vld [vmem:[%s5362_s23 + $0x4b] sm:$0xff] }
  0x80   : > { %5181 = vmatprep.subr.msk.mxu1 %vm355_vm0, %v5728_v1  ;;  %5237 = vmatprep.subr.msk.mxu0 %vm355_vm0, %v5733_v46 }
  0x81   : > { %4963 = vmatmul.mubr.msk.f32.gmra.mxu1 %vm246_vm1, %v5501_v54  ;;  %5019 = vmatmul.mubr.msk.f32.gmra.mxu0 %vm246_vm1, %v1823_v50  ;;  %v1828_v54 = vld [vmem:[%s5362_s23 + $0x53] sm:$0xff] }
  0x82   : > { %4965 = vmatprep.mubr.msk.f32.mxu1 %vm246_vm1, %v5505_v56  ;;  %5021 = vmatprep.mubr.msk.f32.mxu0 %vm246_vm1, %v1824_v3  ;;  %v1829_v56 = vld [vmem:[%s5362_s23 + $0x5b] sm:$0xff] }
  0x85   : > { %4966 = vmatmul.mubr.msk.f32.gmra.mxu1 %vm246_vm1, %v5515_v58  ;;  %5022 = vmatmul.mubr.msk.f32.gmra.mxu0 %vm246_vm1, %v1825_v47  ;;  %v1830_v58 = vld [vmem:[%s5362_s23 + $0x63] sm:$0xff] }
  0x86   : > { %4968 = vmatprep.mubr.msk.f32.mxu1 %vm246_vm1, %v5519_v60  ;;  %5024 = vmatprep.mubr.msk.f32.mxu0 %vm246_vm1, %v1826_v48  ;;  %v1831_v60 = vld [vmem:[%s5362_s23 + $0x6b] sm:$0xff]  ;;  %v2695_v47 = vld [vmem:[%s5362_s23 + $0x9c] sm:$0xff] }
  0x89   : > { %4969 = vmatmul.mubr.msk.f32.gmra.mxu1 %vm246_vm1, %v5529_v62  ;;  %5025 = vmatmul.mubr.msk.f32.gmra.mxu0 %vm246_vm1, %v1827_v52  ;;  %v1832_v62 = vld [vmem:[%s5362_s23 + $0x73] sm:$0xff] }
  0x8a   : > { %4971 = vmatprep.mubr.msk.f32.mxu1 %vm246_vm1, %v5533_v0  ;;  %5027 = vmatprep.mubr.msk.f32.mxu0 %vm246_vm1, %v1828_v54  ;;  %v1833_v0 = vld [vmem:[%s5362_s23 + $0x7b] sm:$0xff]  ;;  %v2696_v54 = vld [vmem:[%s5362_s23 + $0xa4] sm:$0xff] }
  0x8d   : > { %4972 = vmatmul.mubr.msk.f32.gmra.mxu1 %vm246_vm1, %v5543_v2  ;;  %5028 = vmatmul.mubr.msk.f32.gmra.mxu0 %vm246_vm1, %v1829_v56  ;;  %v1834_v2 = vld [vmem:[%s5362_s23 + $0x83] sm:$0xff] }
  0x8e   : > { %4974 = vmatprep.mubr.msk.f32.mxu1 %vm246_vm1, %v5547_v4  ;;  %5030 = vmatprep.mubr.msk.f32.mxu0 %vm246_vm1, %v1830_v58  ;;  %v1835_v4 = vld [vmem:[%s5362_s23 + $0x8b] sm:$0xff] }
  0x91   : > { %4975 = vmatmul.mubr.msk.f32.gmra.mxu1 %vm246_vm1, %v5557_v6  ;;  %5031 = vmatmul.mubr.msk.f32.gmra.mxu0 %vm246_vm1, %v1831_v60  ;;  %v1837_v6 = vld [vmem:[%s5362_s23 + $0x9b] sm:$0xff]  ;;  %v2697_v60 = vld [vmem:[%s5362_s23 + $0xac] sm:$0xff] }
  0x92   : > { %4977 = vmatprep.mubr.msk.f32.mxu1 %vm246_vm1, %v5561_v8  ;;  %5033 = vmatprep.mubr.msk.f32.mxu0 %vm246_vm1, %v1832_v62  ;;  %v1839_v8 = vld [vmem:[%s5362_s23 + $0xab] sm:$0xff] }
  0x95   : > { %4978 = vmatmul.mubr.msk.f32.gmra.mxu1 %vm246_vm1, %v5571_v10  ;;  %5034 = vmatmul.mubr.msk.f32.gmra.mxu0 %vm246_vm1, %v1833_v0  ;;  %v1841_v10 = vld [vmem:[%s5362_s23 + $0xbb] sm:$0xff] }
  0x96   : > { %4980 = vmatprep.mubr.msk.f32.mxu1 %vm246_vm1, %v5575_v12  ;;  %5036 = vmatprep.mubr.msk.f32.mxu0 %vm246_vm1, %v1834_v2  ;;  %v1843_v12 = vld [vmem:[%s5362_s23 + $0xcb] sm:$0xff]  ;;  %v2698_v2 = vld [vmem:[%s5362_s23 + $0xb4] sm:$0xff] }
  0x99   : > { %4981 = vmatmul.mubr.msk.f32.gmra.mxu1 %vm246_vm1, %v5585_v14  ;;  %5037 = vmatmul.mubr.msk.f32.gmra.mxu0 %vm246_vm1, %v1835_v4  ;;  %v1845_v14 = vld [vmem:[%s5362_s23 + $0xdb] sm:$0xff] }
  0x9a   : > { %4983 = vmatprep.mubr.msk.f32.mxu1 %vm246_vm1, %v5589_v16  ;;  %5039 = vmatprep.mubr.msk.f32.mxu0 %vm246_vm1, %v1836_v5  ;;  %v1847_v16 = vld [vmem:[%s5362_s23 + $0xeb] sm:$0xff] }
  0x9d   : > { %4984 = vmatmul.mubr.msk.f32.gmra.mxu1 %vm246_vm1, %v5599_v18  ;;  %5040 = vmatmul.mubr.msk.f32.gmra.mxu0 %vm246_vm1, %v1837_v6  ;;  %v1849_v18 = vld [vmem:[%s5362_s23 + $0xfb] sm:$0xff] }
  0x9e   : > { %4986 = vmatprep.mubr.msk.f32.mxu1 %vm246_vm1, %v5603_v20  ;;  %5042 = vmatprep.mubr.msk.f32.mxu0 %vm246_vm1, %v1838_v7  ;;  %v1851_v20 = vld [vmem:[%s5362_s23 + $0x10b] sm:$0xff]  ;;  %v2699_v6 = vld [vmem:[%s5362_s23 + $0xbc] sm:$0xff] }
  0xa1   : > { %4987 = vmatmul.mubr.msk.f32.gmra.mxu1 %vm246_vm1, %v5613_v22  ;;  %5043 = vmatmul.mubr.msk.f32.gmra.mxu0 %vm246_vm1, %v1839_v8  ;;  %v1853_v22 = vld [vmem:[%s5362_s23 + $0x11b] sm:$0xff] }
  0xa2   : > { %4989 = vmatprep.mubr.msk.f32.mxu1 %vm246_vm1, %v5617_v24  ;;  %5045 = vmatprep.mubr.msk.f32.mxu0 %vm246_vm1, %v1840_v9  ;;  %v1854_v24 = vld [vmem:[%s5362_s23 + $0x123] sm:$0xff] }
  0xa3   : > { %v2700_v9 = vld [vmem:[%s5362_s23 + $0xc4] sm:$0xff] }
  0xa5   : > { %4990 = vmatmul.mubr.msk.f32.gmra.mxu1 %vm246_vm1, %v5627_v26  ;;  %5046 = vmatmul.mubr.msk.f32.gmra.mxu0 %vm246_vm1, %v1841_v10  ;;  %v1855_v26 = vld [vmem:[%s5362_s23 + $0x12b] sm:$0xff] }
  0xa6   : > { %4992 = vmatprep.mubr.msk.f32.mxu1 %vm246_vm1, %v5631_v28  ;;  %5048 = vmatprep.mubr.msk.f32.mxu0 %vm246_vm1, %v1842_v11  ;;  %v2680_v28 = vld [vmem:[%s5362_s23 + $0x24] sm:$0xff] }
  0xa9   : > { %4993 = vmatmul.mubr.msk.f32.gmra.mxu1 %vm246_vm1, %v5641_v30  ;;  %5049 = vmatmul.mubr.msk.f32.gmra.mxu0 %vm246_vm1, %v1843_v12  ;;  %v2681_v30 = vld [vmem:[%s5362_s23 + $0x2c] sm:$0xff] }
  0xaa   : > { %4995 = vmatprep.mubr.msk.f32.mxu1 %vm246_vm1, %v5645_v32  ;;  %5051 = vmatprep.mubr.msk.f32.mxu0 %vm246_vm1, %v1844_v13  ;;  %v2683_v32 = vld [vmem:[%s5362_s23 + $0x3c] sm:$0xff]  ;;  %v2701_v12 = vld [vmem:[%s5362_s23 + $0xcc] sm:$0xff] }
  0xad   : > { %4996 = vmatmul.mubr.msk.f32.gmra.mxu1 %vm246_vm1, %v5655_v34  ;;  %5052 = vmatmul.mubr.msk.f32.gmra.mxu0 %vm246_vm1, %v1845_v14  ;;  %v2685_v34 = vld [vmem:[%s5362_s23 + $0x4c] sm:$0xff] }
  0xae   : > { %4998 = vmatprep.mubr.msk.f32.mxu1 %vm246_vm1, %v5659_v36  ;;  %5054 = vmatprep.mubr.msk.f32.mxu0 %vm246_vm1, %v1846_v15  ;;  %v2687_v36 = vld [vmem:[%s5362_s23 + $0x5c] sm:$0xff]  ;;  %v2702_v15 = vld [vmem:[%s5362_s23 + $0xd4] sm:$0xff] }
  0xb1   : > { %4999 = vmatmul.mubr.msk.f32.gmra.mxu1 %vm246_vm1, %v5669_v38  ;;  %5055 = vmatmul.mubr.msk.f32.gmra.mxu0 %vm246_vm1, %v1847_v16 }
  0xb2   : > { %5001 = vmatprep.mubr.msk.f32.mxu1 %vm246_vm1, %v5673_v40  ;;  %5057 = vmatprep.mubr.msk.f32.mxu0 %vm246_vm1, %v1848_v17  ;;  %v2689_v40 = vld [vmem:[%s5362_s23 + $0x6c] sm:$0xff] }
  0xb5   : > { %5002 = vmatmul.mubr.msk.f32.gmra.mxu1 %vm246_vm1, %v5683_v42  ;;  %5058 = vmatmul.mubr.msk.f32.gmra.mxu0 %vm246_vm1, %v1849_v18  ;;  %v2703_v18 = vld [vmem:[%s5362_s23 + $0xdc] sm:$0xff] }
  0xb6   : > { %5004 = vmatprep.mubr.msk.f32.mxu1 %vm246_vm1, %v5687_v44  ;;  %5060 = vmatprep.mubr.msk.f32.mxu0 %vm246_vm1, %v1850_v19 }
  0xb9   : > { %5005 = vmatmul.mubr.msk.f32.gmra.mxu1 %vm246_vm1, %v5697_v49  ;;  %5061 = vmatmul.mubr.msk.f32.gmra.mxu0 %vm246_vm1, %v1851_v20  ;;  %v2691_v49 = vld [vmem:[%s5362_s23 + $0x7c] sm:$0xff] }
  0xba   : > { %5007 = vmatprep.mubr.msk.f32.mxu1 %vm246_vm1, %v5701_v53  ;;  %5063 = vmatprep.mubr.msk.f32.mxu0 %vm246_vm1, %v1852_v21  ;;  %v2704_v21 = vld [vmem:[%s5362_s23 + $0xe4] sm:$0xff] }
  0xbd   : > { %5008 = vmatmul.mubr.msk.f32.gmra.mxu1 %vm246_vm1, %v5711_v57  ;;  %5064 = vmatmul.mubr.msk.f32.gmra.mxu0 %vm246_vm1, %v1853_v22 }
  0xbe   : > { %5010 = vmatprep.mubr.msk.f32.mxu1 %vm246_vm1, %v1424_v23  ;;  %5066 = vmatprep.mubr.msk.f32.mxu0 %vm246_vm1, %v1854_v24  ;;  %v2705_v24 = vld [vmem:[%s5362_s23 + $0xec] sm:$0xff] }
  0xc1   : > { %5011 = vmatmul.mubr.msk.f32.gmra.mxu1 %vm246_vm1, %v1425_v25  ;;  %5067 = vmatmul.mubr.msk.f32.gmra.mxu0 %vm246_vm1, %v1855_v26 }
  0xc2   : > { %5071 = vmatprep.mubr.msk.f32.mxu1 %vm246_vm1, %v2250_v27  ;;  %5127 = vmatprep.mubr.msk.f32.mxu0 %vm246_vm1, %v2680_v28  ;;  %v2706_v27 = vld [vmem:[%s5362_s23 + $0xf4] sm:$0xff] }
  0xc5   : > { %5072 = vmatmul.mubr.msk.f32.vlgmr.msra.gmra.mxu1 %vm246_vm1, %v2251_v29  ;;  %5128 = vmatmul.mubr.msk.f32.vlgmr.msra.gmra.mxu0 %vm246_vm1, %v2681_v30 }
  0xc6   : > { %5182 = vmatpush3.msk.msra.mxu1 %vm355_vm0, %v5728_v1  ;;  %5238 = vmatpush3.msk.msra.mxu0 %vm355_vm0, %v5733_v46  ;;  %v2694_v46 = vld [vmem:[%s5362_s23 + $0x94] sm:$0xff] }
  0xc7   : > { %5074 = vmatprep.mubr.msk.f32.mxu1 %vm246_vm1, %v2680_v28  ;;  %5130 = vmatprep.mubr.msk.f32.mxu0 %vm246_vm1, %v2682_v31 }
  0xc9   : > { %5075 = vmatmul.mubr.msk.f32.gmra.mxu1 %vm246_vm1, %v2681_v30  ;;  %5131 = vmatmul.mubr.msk.f32.gmra.mxu0 %vm246_vm1, %v2683_v32 }
  0xca   : > { %5077 = vmatprep.mubr.msk.f32.mxu1 %vm246_vm1, %v2682_v31  ;;  %5133 = vmatprep.mubr.msk.f32.mxu0 %vm246_vm1, %v2684_v33  ;;  %v2707_v31 = vld [vmem:[%s5362_s23 + $0xfc] sm:$0xff] }
  0xcd   : > { %5078 = vmatmul.mubr.msk.f32.gmra.mxu1 %vm246_vm1, %v2683_v32  ;;  %5134 = vmatmul.mubr.msk.f32.gmra.mxu0 %vm246_vm1, %v2685_v34 }
  0xce   : > { %5080 = vmatprep.mubr.msk.f32.mxu1 %vm246_vm1, %v2684_v33  ;;  %5136 = vmatprep.mubr.msk.f32.mxu0 %vm246_vm1, %v2686_v35 }
  0xd1   : > { %v5907_v38 = vpop.f32.mrf.mxu0  ;;  %v5909_v39 = vpop.f32.mrf.mxu1  ;;  %5081 = vmatmul.mubr.msk.f32.gmra.mxu1 %vm246_vm1, %v2685_v34  ;;  %5137 = vmatmul.mubr.msk.f32.gmra.mxu0 %vm246_vm1, %v2687_v36  ;;  %v2708_v34 = vld [vmem:[%s5362_s23 + $0x104] sm:$0xff] }
  0xd2   : > { %5083 = vmatprep.mubr.msk.f32.mxu1 %vm246_vm1, %v2686_v35  ;;  %5139 = vmatprep.mubr.msk.f32.mxu0 %vm246_vm1, %v2688_v37 }
  0xd3   : > { %v5916_v41 = vpop.f32.mrf.mxu0  ;;  %v5918_v42 = vpop.f32.mrf.mxu1 }
  0xd5   : > { %v5921_v44 = vpop.f32.mrf.mxu0  ;;  %v5923_v45 = vpop.f32.mrf.mxu1  ;;  %5084 = vmatmul.mubr.msk.f32.gmra.mxu1 %vm246_vm1, %v2687_v36  ;;  %5140 = vmatmul.mubr.msk.f32.gmra.mxu0 %vm246_vm1, %v2689_v40 }
  0xd6   : > { %5086 = vmatprep.mubr.msk.f32.mxu1 %vm246_vm1, %v2688_v37  ;;  %5142 = vmatprep.mubr.msk.f32.mxu0 %vm246_vm1, %v2690_v43 }
  0xd7   : > { %v5930_v51 = vpop.f32.mrf.mxu0  ;;  %v5932_v53 = vpop.f32.mrf.mxu1 }
  0xd9   : > { %v5935_v57 = vpop.f32.mrf.mxu0  ;;  %v5937_v59 = vpop.f32.mrf.mxu1  ;;  %5087 = vmatmul.mubr.msk.f32.gmra.mxu1 %vm246_vm1, %v2689_v40  ;;  %5143 = vmatmul.mubr.msk.f32.gmra.mxu0 %vm246_vm1, %v2691_v49 }
  0xda   : > { %5089 = vmatprep.mubr.msk.f32.mxu1 %vm246_vm1, %v2690_v43  ;;  %5145 = vmatprep.mubr.msk.f32.mxu0 %vm246_vm1, %v2692_v55 }
  0xdb   : > { %v5944_v63 = vpop.f32.mrf.mxu0  ;;  %v5946_v1 = vpop.f32.mrf.mxu1 }
  0xdd   : > { %v5949_v50 = vpop.f32.mrf.mxu0  ;;  %v5951_v3 = vpop.f32.mrf.mxu1  ;;  %5090 = vmatmul.mubr.msk.f32.gmra.mxu1 %vm246_vm1, %v2691_v49  ;;  %5146 = vmatmul.mubr.msk.f32.gmra.mxu0 %vm246_vm1, %v2693_v61  ;;  %v2709_v49 = vld [vmem:[%s5362_s23 + $0x10c] sm:$0xff] }
  0xde   : > { %5092 = vmatprep.mubr.msk.f32.mxu1 %vm246_vm1, %v2692_v55  ;;  %5148 = vmatprep.mubr.msk.f32.mxu0 %vm246_vm1, %v2694_v46 }
  0xdf   : > { %v5958_v48 = vpop.f32.mrf.mxu0  ;;  %v5960_v52 = vpop.f32.mrf.mxu1 }
  0xe1   : > { %v5963_v56 = vpop.f32.mrf.mxu0  ;;  %v5965_v58 = vpop.f32.mrf.mxu1  ;;  %5093 = vmatmul.mubr.msk.f32.gmra.mxu1 %vm246_vm1, %v2693_v61  ;;  %5149 = vmatmul.mubr.msk.f32.gmra.mxu0 %vm246_vm1, %v2695_v47 }
  0xe2   : > { %5095 = vmatprep.mubr.msk.f32.mxu1 %vm246_vm1, %v2694_v46  ;;  %5151 = vmatprep.mubr.msk.f32.mxu0 %vm246_vm1, %v2696_v54 }
  0xe3   : > { %v5972_v62 = vpop.f32.mrf.mxu0  ;;  %v5974_v0 = vpop.f32.mrf.mxu1 }
  0xe5   : > { %v5977_v4 = vpop.f32.mrf.mxu0  ;;  %v5979_v5 = vpop.f32.mrf.mxu1  ;;  %5096 = vmatmul.mubr.msk.f32.gmra.mxu1 %vm246_vm1, %v2695_v47  ;;  %5152 = vmatmul.mubr.msk.f32.gmra.mxu0 %vm246_vm1, %v2697_v60 }
  0xe6   : > { %5098 = vmatprep.mubr.msk.f32.mxu1 %vm246_vm1, %v2696_v54  ;;  %5154 = vmatprep.mubr.msk.f32.mxu0 %vm246_vm1, %v2698_v2 }
  0xe7   : > { %v5986_v7 = vpop.f32.mrf.mxu0  ;;  %v5988_v8 = vpop.f32.mrf.mxu1 }
  0xe9   : > { %v5991_v10 = vpop.f32.mrf.mxu0  ;;  %v5993_v11 = vpop.f32.mrf.mxu1  ;;  %5099 = vmatmul.mubr.msk.f32.gmra.mxu1 %vm246_vm1, %v2697_v60  ;;  %5155 = vmatmul.mubr.msk.f32.gmra.mxu0 %vm246_vm1, %v2699_v6 }
  0xea   : > { %5101 = vmatprep.mubr.msk.f32.mxu1 %vm246_vm1, %v2698_v2  ;;  %5157 = vmatprep.mubr.msk.f32.mxu0 %vm246_vm1, %v2700_v9 }
  0xeb   : > { %v6000_v13 = vpop.f32.mrf.mxu0  ;;  %v6002_v14 = vpop.f32.mrf.mxu1 }
  0xed   : > { %v6005_v16 = vpop.f32.mrf.mxu0  ;;  %v6007_v17 = vpop.f32.mrf.mxu1  ;;  %5102 = vmatmul.mubr.msk.f32.gmra.mxu1 %vm246_vm1, %v2699_v6  ;;  %5158 = vmatmul.mubr.msk.f32.gmra.mxu0 %vm246_vm1, %v2701_v12  ;;  %v2711_v6 = vld [vmem:[%s5362_s23 + $0x11c] sm:$0xff] }
  0xee   : > { %5104 = vmatprep.mubr.msk.f32.mxu1 %vm246_vm1, %v2700_v9  ;;  %5160 = vmatprep.mubr.msk.f32.mxu0 %vm246_vm1, %v2702_v15 }
  0xef   : > { %v6014_v19 = vpop.f32.mrf.mxu0  ;;  %v6016_v20 = vpop.f32.mrf.mxu1 }
  0xf1   : > { %v6019_v22 = vpop.f32.mrf.mxu0  ;;  %v6021_v23 = vpop.f32.mrf.mxu1  ;;  %5105 = vmatmul.mubr.msk.f32.gmra.mxu1 %vm246_vm1, %v2701_v12  ;;  %5161 = vmatmul.mubr.msk.f32.gmra.mxu0 %vm246_vm1, %v2703_v18 }
  0xf2   : > { %5107 = vmatprep.mubr.msk.f32.mxu1 %vm246_vm1, %v2702_v15  ;;  %5163 = vmatprep.mubr.msk.f32.mxu0 %vm246_vm1, %v2704_v21 }
  0xf3   : > { %v6028_v25 = vpop.f32.mrf.mxu0  ;;  %v6030_v26 = vpop.f32.mrf.mxu1 }
  0xf5   : > { %v4849_v28 = vpop.f32.mrf.mxu1  ;;  %v4905_v29 = vpop.f32.mrf.mxu0  ;;  %5108 = vmatmul.mubr.msk.f32.gmra.mxu1 %vm246_vm1, %v2703_v18  ;;  %5164 = vmatmul.mubr.msk.f32.gmra.mxu0 %vm246_vm1, %v2705_v24 }
  0xf6   : > { %v787_v30 = vadd.f32 %v4849_v28, %v5907_v38  ;;  %5110 = vmatprep.mubr.msk.f32.mxu1 %vm246_vm1, %v2704_v21  ;;  %5166 = vmatprep.mubr.msk.f32.mxu0 %vm246_vm1, %v2706_v27  ;;  %v2713_v28 = vld [vmem:[%s5362_s23 + $0x12c] sm:$0xff] }
  0xf7   : > { %v781_v32 = vpop.f32.mrf.mxu1  ;;  %v1175_v33 = vpop.f32.mrf.mxu0 }
  0xf8   : > { %v6040_v35 = vadd.f32 %v4905_v29, %v787_v30  ;;  %v782_v36 = vadd.f32 %v781_v32, %v5916_v41  ;;  %v2710_v41 = vld [vmem:[%s5362_s23 + $0x114] sm:$0xff] }
  0xf9   : > { %v4852_v37 = vpop.f32.mrf.mxu1  ;;  %v4908_v40 = vpop.f32.mrf.mxu0  ;;  %5111 = vmatmul.mubr.msk.f32.gmra.mxu1 %vm246_vm1, %v2705_v24  ;;  %5167 = vmatmul.mubr.msk.f32.gmra.mxu0 %vm246_vm1, %v2707_v31 }
  0xfa   : > { %v6045_v38 = vadd.f32 %v1175_v33, %v782_v36  ;;  %v797_v43 = vadd.f32 %v4852_v37, %v5921_v44  ;;  %5113 = vmatprep.mubr.msk.f32.mxu1 %vm246_vm1, %v2706_v27  ;;  %5169 = vmatprep.mubr.msk.f32.mxu0 %vm246_vm1, %v2708_v34  ;;  %v2715_v37 = vld [vmem:[%s5362_s23 + $0x13c] sm:$0xff] }
  0xfb   : > { %v791_v55 = vpop.f32.mrf.mxu1  ;;  %v1185_v61 = vpop.f32.mrf.mxu0 }
  0xfc   : > { %v6052_v46 = vadd.f32 %v4908_v40, %v797_v43  ;;  %v792_v47 = vadd.f32 %v791_v55, %v5930_v51  ;;  %v2712_v51 = vld [vmem:[%s5362_s23 + $0x124] sm:$0xff] }
  0xfd   : > { %v4855_v54 = vpop.f32.mrf.mxu1  ;;  %v4911_v60 = vpop.f32.mrf.mxu0  ;;  %5114 = vmatmul.mubr.msk.f32.gmra.mxu1 %vm246_vm1, %v2707_v31  ;;  %5170 = vmatmul.mubr.msk.f32.gmra.mxu0 %vm246_vm1, %v2709_v49 }
  0xfe   : > { %v6057_v44 = vadd.f32 %v1185_v61, %v792_v47  ;;  %v807_v2 = vadd.f32 %v4855_v54, %v5935_v57  ;;  %5116 = vmatprep.mubr.msk.f32.mxu1 %vm246_vm1, %v2708_v34  ;;  %5172 = vmatprep.mubr.msk.f32.mxu0 %vm246_vm1, %v2710_v41 }
  0xff   : > { %v801_v9 = vpop.f32.mrf.mxu1  ;;  %v1195_v12 = vpop.f32.mrf.mxu0 }
 0x100   : > { %v6064_v15 = vadd.f32 %v4911_v60, %v807_v2  ;;  %v802_v18 = vadd.f32 %v801_v9, %v5944_v63  ;;  %v2714_v63 = vld [vmem:[%s5362_s23 + $0x134] sm:$0xff] }
 0x101   : > { %v4858_v21 = vpop.f32.mrf.mxu1  ;;  %v4914_v24 = vpop.f32.mrf.mxu0  ;;  %5117 = vmatmul.mubr.msk.f32.gmra.mxu1 %vm246_vm1, %v2709_v49  ;;  %5173 = vmatmul.mubr.msk.f32.gmra.mxu0 %vm246_vm1, %v2711_v6  ;;  %v3540_v49 = vld [vmem:[%s5362_s23 + $0x26] sm:$0xff]  ;;  %v3541_v2 = vld [vmem:[%s5362_s23 + $0x2e] sm:$0xff] }
 0x102   : > { %v6069_v57 = vadd.f32 %v1195_v12, %v802_v18  ;;  %v817_v27 = vadd.f32 %v4858_v21, %v5949_v50  ;;  %5119 = vmatprep.mubr.msk.f32.mxu1 %vm246_vm1, %v2710_v41  ;;  %5175 = vmatprep.mubr.msk.f32.mxu0 %vm246_vm1, %v2712_v51  ;;  %v3111_v60 = vld [vmem:[%s5362_s23 + $0x2d] sm:$0xff]  ;;  %v3112_v9 = vld [vmem:[%s5362_s23 + $0x35] sm:$0xff] }
 0x103   : > { %v811_v29 = vpop.f32.mrf.mxu1  ;;  %v1205_v30 = vpop.f32.mrf.mxu0  ;;  %v3542_v12 = vld [vmem:[%s5362_s23 + $0x36] sm:$0xff] }
 0x104   : > { %v6076_v31 = vadd.f32 %v4914_v24, %v817_v27  ;;  %v812_v32 = vadd.f32 %v811_v29, %v5958_v48  ;;  %v3110_v48 = vld [vmem:[%s5362_s23 + $0x25] sm:$0xff] }
 0x105   : > { %v4861_v33 = vpop.f32.mrf.mxu1  ;;  %v4917_v34 = vpop.f32.mrf.mxu0  ;;  %5120 = vmatmul.mubr.msk.f32.gmra.mxu1 %vm246_vm1, %v2711_v6  ;;  %5176 = vmatmul.mubr.msk.f32.gmra.mxu0 %vm246_vm1, %v2713_v28  ;;  %v3543_v29 = vld [vmem:[%s5362_s23 + $0x3e] sm:$0xff] }
 0x106   : > { %v6081_v50 = vadd.f32 %v1205_v30, %v812_v32  ;;  %v827_v36 = vadd.f32 %v4861_v33, %v5963_v56  ;;  %5122 = vmatprep.mubr.msk.f32.mxu1 %vm246_vm1, %v2712_v51  ;;  %5178 = vmatprep.mubr.msk.f32.mxu0 %vm246_vm1, %v2714_v63  ;;  %v3114_v63 = vld [vmem:[%s5362_s23 + $0x45] sm:$0xff] }
 0x107   : > { %v821_v40 = vpop.f32.mrf.mxu1  ;;  %v1215_v43 = vpop.f32.mrf.mxu0  ;;  %v3544_v32 = vld [vmem:[%s5362_s23 + $0x46] sm:$0xff] }
 0x108   : > { %v6089_v55 = vadd.f32 %v4917_v34, %v827_v36  ;;  %v822_v61 = vadd.f32 %v821_v40, %v5972_v62 }
 0x109   : > { %v4864_v41 = vpop.f32.mrf.mxu1  ;;  %v4920_v47 = vpop.f32.mrf.mxu0  ;;  %5123 = vmatmul.mubr.msk.f32.gmra.mxu1 %vm246_vm1, %v2713_v28  ;;  %5179 = vmatmul.mubr.msk.f32.gmra.mxu0 %vm246_vm1, %v2715_v37  ;;  %v3113_v28 = vld [vmem:[%s5362_s23 + $0x3d] sm:$0xff] }
 0x10a   : > { %v6094_v56 = vadd.f32 %v1215_v43, %v822_v61  ;;  %v837_v54 = vadd.f32 %v4864_v41, %v5977_v4  ;;  %5183 = vmatprep.mubr.msk.f32.mxu1 %vm246_vm1, %v3110_v48  ;;  %5239 = vmatprep.mubr.msk.f32.mxu0 %vm246_vm1, %v3540_v49  ;;  %v3115_v43 = vld [vmem:[%s5362_s23 + $0x4d] sm:$0xff]  ;;  %v3116_v61 = vld [vmem:[%s5362_s23 + $0x55] sm:$0xff] }
 0x10b   : > { %v831_v6 = vpop.f32.mrf.mxu1  ;;  %v1225_v62 = vpop.f32.mrf.mxu0  ;;  %v3545_v48 = vld [vmem:[%s5362_s23 + $0x4e] sm:$0xff]  ;;  %v3546_v41 = vld [vmem:[%s5362_s23 + $0x56] sm:$0xff] }
 0x10c   : > { %v6103_v51 = vadd.f32 %v4920_v47, %v837_v54  ;;  %v832_v18 = vadd.f32 %v831_v6, %v5986_v7 }
 0x10d   : > { %v4867_v21 = vpop.f32.mrf.mxu1  ;;  %v4923_v4 = vpop.f32.mrf.mxu0  ;;  %5184 = vmatmul.mubr.msk.f32.vlgmr.msra.gmra.mxu1 %vm246_vm1, %v3111_v60  ;;  %5240 = vmatmul.mubr.msk.f32.vlgmr.msra.gmra.mxu0 %vm246_vm1, %v3541_v2 }
 0x10e   : > { %v6108_v24 = vadd.f32 %v1225_v62, %v832_v18  ;;  %v847_v27 = vadd.f32 %v4867_v21, %v5991_v10  ;;  %5186 = vmatprep.mubr.msk.f32.mxu1 %vm246_vm1, %v3112_v9  ;;  %5242 = vmatprep.mubr.msk.f32.mxu0 %vm246_vm1, %v3542_v12  ;;  %v3117_v62 = vld [vmem:[%s5362_s23 + $0x5d] sm:$0xff]  ;;  %v3118_v18 = vld [vmem:[%s5362_s23 + $0x65] sm:$0xff] }
 0x10f   : > { %v841_v30 = vpop.f32.mrf.mxu1  ;;  %v1235_v7 = vpop.f32.mrf.mxu0  ;;  %v3547_v9 = vld [vmem:[%s5362_s23 + $0x5e] sm:$0xff]  ;;  %v3548_v21 = vld [vmem:[%s5362_s23 + $0x66] sm:$0xff] }
 0x110   : > { %v6117_v33 = vadd.f32 %v4923_v4, %v847_v27  ;;  %v842_v34 = vadd.f32 %v841_v30, %v6000_v13 }
 0x111   : > { %v4870_v36 = vpop.f32.mrf.mxu1  ;;  %v4926_v10 = vpop.f32.mrf.mxu0  ;;  %5187 = vmatmul.mubr.msk.f32.gmra.mxu1 %vm246_vm1, %v3113_v28  ;;  %5243 = vmatmul.mubr.msk.f32.gmra.mxu0 %vm246_vm1, %v3543_v29 }
 0x112   : > { %v6122_v37 = vadd.f32 %v1235_v7, %v842_v34  ;;  %v857_v40 = vadd.f32 %v4870_v36, %v6005_v16  ;;  %5189 = vmatprep.mubr.msk.f32.mxu1 %vm246_vm1, %v3114_v63  ;;  %5245 = vmatprep.mubr.msk.f32.mxu0 %vm246_vm1, %v3544_v32  ;;  %v3119_v7 = vld [vmem:[%s5362_s23 + $0x6d] sm:$0xff]  ;;  %v3120_v34 = vld [vmem:[%s5362_s23 + $0x75] sm:$0xff] }
 0x113   : > { %v851_v49 = vpop.f32.mrf.mxu1  ;;  %v1245_v13 = vpop.f32.mrf.mxu0  ;;  %v3549_v63 = vld [vmem:[%s5362_s23 + $0x6e] sm:$0xff]  ;;  %v3550_v36 = vld [vmem:[%s5362_s23 + $0x76] sm:$0xff] }
 0x114   : > { %v6131_v47 = vadd.f32 %v4926_v10, %v857_v40  ;;  %v852_v54 = vadd.f32 %v851_v49, %v6014_v19 }
 0x115   : > { %v4873_v60 = vpop.f32.mrf.mxu1  ;;  %v4929_v16 = vpop.f32.mrf.mxu0  ;;  %5190 = vmatmul.mubr.msk.f32.gmra.mxu1 %vm246_vm1, %v3115_v43  ;;  %5246 = vmatmul.mubr.msk.f32.gmra.mxu0 %vm246_vm1, %v3545_v48 }
 0x116   : > { %v6136_v2 = vadd.f32 %v1245_v13, %v852_v54  ;;  %v867_v6 = vadd.f32 %v4873_v60, %v6019_v22  ;;  %5192 = vmatprep.mubr.msk.f32.mxu1 %vm246_vm1, %v3116_v61  ;;  %5248 = vmatprep.mubr.msk.f32.mxu0 %vm246_vm1, %v3546_v41  ;;  %v3121_v13 = vld [vmem:[%s5362_s23 + $0x7d] sm:$0xff]  ;;  %v3122_v54 = vld [vmem:[%s5362_s23 + $0x85] sm:$0xff] }
 0x117   : > { %v861_v12 = vpop.f32.mrf.mxu1  ;;  %v1255_v19 = vpop.f32.mrf.mxu0  ;;  %v3551_v61 = vld [vmem:[%s5362_s23 + $0x7e] sm:$0xff]  ;;  %v3552_v60 = vld [vmem:[%s5362_s23 + $0x86] sm:$0xff] }
 0x118   : > { %v6145_v4 = vadd.f32 %v4929_v16, %v867_v6  ;;  %v862_v27 = vadd.f32 %v861_v12, %v6028_v25 }
 0x119   : > { %v4876_v28 = vpop.f32.mrf.mxu1  ;;  %v4932_v22 = vpop.f32.mrf.mxu0  ;;  %5193 = vmatmul.mubr.msk.f32.gmra.mxu1 %vm246_vm1, %v3117_v62  ;;  %5249 = vmatmul.mubr.msk.f32.gmra.mxu0 %vm246_vm1, %v3547_v9 }
 0x11a   : > { %v6150_v29 = vadd.f32 %v1255_v19, %v862_v27  ;;  %v877_v30 = vadd.f32 %v4876_v28, %v5909_v39  ;;  %5195 = vmatprep.mubr.msk.f32.mxu1 %vm246_vm1, %v3118_v18  ;;  %5251 = vmatprep.mubr.msk.f32.mxu0 %vm246_vm1, %v3548_v21  ;;  %v3123_v19 = vld [vmem:[%s5362_s23 + $0x8d] sm:$0xff]  ;;  %v3124_v27 = vld [vmem:[%s5362_s23 + $0x95] sm:$0xff] }
 0x11b   : > { %v871_v32 = vpop.f32.mrf.mxu1  ;;  %v1265_v25 = vpop.f32.mrf.mxu0  ;;  %v3553_v18 = vld [vmem:[%s5362_s23 + $0x8e] sm:$0xff]  ;;  %v3554_v28 = vld [vmem:[%s5362_s23 + $0x96] sm:$0xff] }
 0x11c   : > { %v6159_v10 = vadd.f32 %v4932_v22, %v877_v30  ;;  %v872_v40 = vadd.f32 %v871_v32, %v5918_v42 }
 0x11d   : > { %v4879_v43 = vpop.f32.mrf.mxu1  ;;  %v4935_v39 = vpop.f32.mrf.mxu0  ;;  %5196 = vmatmul.mubr.msk.f32.gmra.mxu1 %vm246_vm1, %v3119_v7  ;;  %5252 = vmatmul.mubr.msk.f32.gmra.mxu0 %vm246_vm1, %v3549_v63 }
 0x11e   : > { %v6164_v48 = vadd.f32 %v1265_v25, %v872_v40  ;;  %v887_v49 = vadd.f32 %v4879_v43, %v5923_v45  ;;  %5198 = vmatprep.mubr.msk.f32.mxu1 %vm246_vm1, %v3120_v34  ;;  %5254 = vmatprep.mubr.msk.f32.mxu0 %vm246_vm1, %v3550_v36  ;;  %v3125_v25 = vld [vmem:[%s5362_s23 + $0x9d] sm:$0xff]  ;;  %v3126_v40 = vld [vmem:[%s5362_s23 + $0xa5] sm:$0xff] }
 0x11f   : > { %v881_v41 = vpop.f32.mrf.mxu1  ;;  %v1275_v42 = vpop.f32.mrf.mxu0  ;;  %v3555_v34 = vld [vmem:[%s5362_s23 + $0x9e] sm:$0xff]  ;;  %v3556_v43 = vld [vmem:[%s5362_s23 + $0xa6] sm:$0xff] }
 0x120   : > { %v6173_v16 = vadd.f32 %v4935_v39, %v887_v49  ;;  %v882_v6 = vadd.f32 %v881_v41, %v5932_v53 }
 0x121   : > { %v4882_v62 = vpop.f32.mrf.mxu1  ;;  %v4938_v45 = vpop.f32.mrf.mxu0  ;;  %5199 = vmatmul.mubr.msk.f32.gmra.mxu1 %vm246_vm1, %v3121_v13  ;;  %5255 = vmatmul.mubr.msk.f32.gmra.mxu0 %vm246_vm1, %v3551_v61 }
 0x122   : > { %v6178_v9 = vadd.f32 %v1275_v42, %v882_v6  ;;  %v897_v12 = vadd.f32 %v4882_v62, %v5937_v59  ;;  %5201 = vmatprep.mubr.msk.f32.mxu1 %vm246_vm1, %v3122_v54  ;;  %5257 = vmatprep.mubr.msk.f32.mxu0 %vm246_vm1, %v3552_v60  ;;  %v3127_v42 = vld [vmem:[%s5362_s23 + $0xad] sm:$0xff]  ;;  %v3128_v6 = vld [vmem:[%s5362_s23 + $0xb5] sm:$0xff] }
 0x123   : > { %v891_v21 = vpop.f32.mrf.mxu1  ;;  %v1285_v53 = vpop.f32.mrf.mxu0  ;;  %v3557_v54 = vld [vmem:[%s5362_s23 + $0xae] sm:$0xff]  ;;  %v3558_v62 = vld [vmem:[%s5362_s23 + $0xb6] sm:$0xff] }
 0x124   : > { %v6187_v22 = vadd.f32 %v4938_v45, %v897_v12  ;;  %v892_v30 = vadd.f32 %v891_v21, %v5946_v1 }
 0x125   : > { %v4885_v7 = vpop.f32.mrf.mxu1  ;;  %v4941_v59 = vpop.f32.mrf.mxu0  ;;  %5202 = vmatmul.mubr.msk.f32.gmra.mxu1 %vm246_vm1, %v3123_v19  ;;  %5258 = vmatmul.mubr.msk.f32.gmra.mxu0 %vm246_vm1, %v3553_v18 }
 0x126   : > { %v6192_v63 = vadd.f32 %v1285_v53, %v892_v30  ;;  %v907_v32 = vadd.f32 %v4885_v7, %v5951_v3  ;;  %5204 = vmatprep.mubr.msk.f32.mxu1 %vm246_vm1, %v3124_v27  ;;  %5260 = vmatprep.mubr.msk.f32.mxu0 %vm246_vm1, %v3554_v28  ;;  %v3129_v53 = vld [vmem:[%s5362_s23 + $0xbd] sm:$0xff]  ;;  %v3130_v30 = vld [vmem:[%s5362_s23 + $0xc5] sm:$0xff] }
 0x127   : > { %v901_v36 = vpop.f32.mrf.mxu1  ;;  %v1295_v1 = vpop.f32.mrf.mxu0  ;;  %v3559_v27 = vld [vmem:[%s5362_s23 + $0xbe] sm:$0xff]  ;;  %v3560_v7 = vld [vmem:[%s5362_s23 + $0xc6] sm:$0xff] }
 0x128   : > { %v6201_v39 = vadd.f32 %v4941_v59, %v907_v32  ;;  %v902_v49 = vadd.f32 %v901_v36, %v5960_v52 }
 0x129   : > { %v4888_v13 = vpop.f32.mrf.mxu1  ;;  %v4944_v3 = vpop.f32.mrf.mxu0  ;;  %5205 = vmatmul.mubr.msk.f32.gmra.mxu1 %vm246_vm1, %v3125_v25  ;;  %5261 = vmatmul.mubr.msk.f32.gmra.mxu0 %vm246_vm1, %v3555_v34 }
 0x12a   : > { %v6206_v61 = vadd.f32 %v1295_v1, %v902_v49  ;;  %v917_v41 = vadd.f32 %v4888_v13, %v5965_v58  ;;  %5207 = vmatprep.mubr.msk.f32.mxu1 %vm246_vm1, %v3126_v40  ;;  %5263 = vmatprep.mubr.msk.f32.mxu0 %vm246_vm1, %v3556_v43  ;;  %v3131_v1 = vld [vmem:[%s5362_s23 + $0xcd] sm:$0xff]  ;;  %v3132_v49 = vld [vmem:[%s5362_s23 + $0xd5] sm:$0xff] }
 0x12b   : > { %v911_v60 = vpop.f32.mrf.mxu1  ;;  %v1305_v52 = vpop.f32.mrf.mxu0  ;;  %v3561_v40 = vld [vmem:[%s5362_s23 + $0xce] sm:$0xff]  ;;  %v3562_v13 = vld [vmem:[%s5362_s23 + $0xd6] sm:$0xff] }
 0x12c   : > { %v6215_v45 = vadd.f32 %v4944_v3, %v917_v41  ;;  %v912_v12 = vadd.f32 %v911_v60, %v5974_v0 }
 0x12d   : > { %v4891_v19 = vpop.f32.mrf.mxu1  ;;  %v4947_v58 = vpop.f32.mrf.mxu0  ;;  %5208 = vmatmul.mubr.msk.f32.gmra.mxu1 %vm246_vm1, %v3127_v42  ;;  %5264 = vmatmul.mubr.msk.f32.gmra.mxu0 %vm246_vm1, %v3557_v54 }
 0x12e   : > { %v6220_v18 = vadd.f32 %v1305_v52, %v912_v12  ;;  %v927_v21 = vadd.f32 %v4891_v19, %v5979_v5  ;;  %5210 = vmatprep.mubr.msk.f32.mxu1 %vm246_vm1, %v3128_v6  ;;  %5266 = vmatprep.mubr.msk.f32.mxu0 %vm246_vm1, %v3558_v62  ;;  %v3133_v52 = vld [vmem:[%s5362_s23 + $0xdd] sm:$0xff]  ;;  %v3134_v12 = vld [vmem:[%s5362_s23 + $0xe5] sm:$0xff] }
 0x12f   : > { %v921_v28 = vpop.f32.mrf.mxu1  ;;  %v1315_v0 = vpop.f32.mrf.mxu0  ;;  %v3563_v6 = vld [vmem:[%s5362_s23 + $0xde] sm:$0xff]  ;;  %v3564_v19 = vld [vmem:[%s5362_s23 + $0xe6] sm:$0xff] }
 0x130   : > { %v6229_v59 = vadd.f32 %v4947_v58, %v927_v21  ;;  %v922_v32 = vadd.f32 %v921_v28, %v5988_v8 }
 0x131   : > { %v4894_v25 = vpop.f32.mrf.mxu1  ;;  %v4950_v5 = vpop.f32.mrf.mxu0  ;;  %5211 = vmatmul.mubr.msk.f32.gmra.mxu1 %vm246_vm1, %v3129_v53  ;;  %5267 = vmatmul.mubr.msk.f32.gmra.mxu0 %vm246_vm1, %v3559_v27 }
 0x132   : > { %v6234_v34 = vadd.f32 %v1315_v0, %v922_v32  ;;  %v937_v36 = vadd.f32 %v4894_v25, %v5993_v11  ;;  %5213 = vmatprep.mubr.msk.f32.mxu1 %vm246_vm1, %v3130_v30  ;;  %5269 = vmatprep.mubr.msk.f32.mxu0 %vm246_vm1, %v3560_v7  ;;  %v3135_v0 = vld [vmem:[%s5362_s23 + $0xed] sm:$0xff]  ;;  %v3136_v32 = vld [vmem:[%s5362_s23 + $0xf5] sm:$0xff] }
 0x133   : > { %v931_v43 = vpop.f32.mrf.mxu1  ;;  %v1325_v8 = vpop.f32.mrf.mxu0  ;;  %v3565_v30 = vld [vmem:[%s5362_s23 + $0xee] sm:$0xff]  ;;  %v3566_v25 = vld [vmem:[%s5362_s23 + $0xf6] sm:$0xff] }
 0x134   : > { %v6243_v3 = vadd.f32 %v4950_v5, %v937_v36  ;;  %v932_v41 = vadd.f32 %v931_v43, %v6002_v14 }
 0x135   : > { %v4897_v42 = vpop.f32.mrf.mxu1  ;;  %v4953_v11 = vpop.f32.mrf.mxu0  ;;  %5214 = vmatmul.mubr.msk.f32.gmra.mxu1 %vm246_vm1, %v3131_v1  ;;  %5270 = vmatmul.mubr.msk.f32.gmra.mxu0 %vm246_vm1, %v3561_v40 }
 0x136   : > { %v6248_v54 = vadd.f32 %v1325_v8, %v932_v41  ;;  %v947_v60 = vadd.f32 %v4897_v42, %v6007_v17  ;;  %5216 = vmatprep.mubr.msk.f32.mxu1 %vm246_vm1, %v3132_v49  ;;  %5272 = vmatprep.mubr.msk.f32.mxu0 %vm246_vm1, %v3562_v13  ;;  %v3137_v8 = vld [vmem:[%s5362_s23 + $0xfd] sm:$0xff]  ;;  %v3138_v41 = vld [vmem:[%s5362_s23 + $0x105] sm:$0xff] }
 0x137   : > { %v941_v62 = vpop.f32.mrf.mxu1  ;;  %v1335_v14 = vpop.f32.mrf.mxu0  ;;  %v3567_v49 = vld [vmem:[%s5362_s23 + $0xfe] sm:$0xff]  ;;  %v3568_v42 = vld [vmem:[%s5362_s23 + $0x106] sm:$0xff] }
 0x138   : > { %v6257_v58 = vadd.f32 %v4953_v11, %v947_v60  ;;  %v942_v21 = vadd.f32 %v941_v62, %v6016_v20 }
 0x139   : > { %v4900_v53 = vpop.f32.mrf.mxu1  ;;  %v4956_v17 = vpop.f32.mrf.mxu0  ;;  %5217 = vmatmul.mubr.msk.f32.gmra.mxu1 %vm246_vm1, %v3133_v52  ;;  %5273 = vmatmul.mubr.msk.f32.gmra.mxu0 %vm246_vm1, %v3563_v6 }
 0x13a   : > { %v6262_v27 = vadd.f32 %v1335_v14, %v942_v21  ;;  %v957_v28 = vadd.f32 %v4900_v53, %v6021_v23  ;;  %5219 = vmatprep.mubr.msk.f32.mxu1 %vm246_vm1, %v3134_v12  ;;  %5275 = vmatprep.mubr.msk.f32.mxu0 %vm246_vm1, %v3564_v19  ;;  %v3139_v14 = vld [vmem:[%s5362_s23 + $0x10d] sm:$0xff]  ;;  %v3140_v21 = vld [vmem:[%s5362_s23 + $0x115] sm:$0xff] }
 0x13b   : > { %v951_v7 = vpop.f32.mrf.mxu1  ;;  %v1345_v20 = vpop.f32.mrf.mxu0  ;;  %v3569_v12 = vld [vmem:[%s5362_s23 + $0x10e] sm:$0xff]  ;;  %v3570_v53 = vld [vmem:[%s5362_s23 + $0x116] sm:$0xff] }
 0x13c   : > { %v6271_v5 = vadd.f32 %v4956_v17, %v957_v28  ;;  %v952_v36 = vadd.f32 %v951_v7, %v6030_v26 }
 0x13d   : > { %v4961_v1 = vpop.f32.mrf.mxu1  ;;  %v5017_v23 = vpop.f32.mrf.mxu0  ;;  %5220 = vmatmul.mubr.msk.f32.gmra.mxu1 %vm246_vm1, %v3135_v0  ;;  %5276 = vmatmul.mubr.msk.f32.gmra.mxu0 %vm246_vm1, %v3565_v30 }
 0x13e   : > { %v6276_v40 = vadd.f32 %v1345_v20, %v952_v36  ;;  %v1785_v43 = vadd.f32 %v4961_v1, %v6040_v35  ;;  %5222 = vmatprep.mubr.msk.f32.mxu1 %vm246_vm1, %v3136_v32  ;;  %5278 = vmatprep.mubr.msk.f32.mxu0 %vm246_vm1, %v3566_v25  ;;  %v3141_v20 = vld [vmem:[%s5362_s23 + $0x11d] sm:$0xff]  ;;  %v3142_v36 = vld [vmem:[%s5362_s23 + $0x125] sm:$0xff] }
 0x13f   : > { %v1605_v13 = vpop.f32.mrf.mxu1  ;;  %v2035_v26 = vpop.f32.mrf.mxu0  ;;  %v3571_v32 = vld [vmem:[%s5362_s23 + $0x11e] sm:$0xff]  ;;  %v3572_v1 = vld [vmem:[%s5362_s23 + $0x126] sm:$0xff] }
 0x140   : > { %v6285_v11 = vadd.f32 %v5017_v23, %v1785_v43  ;;  %v1784_v60 = vadd.f32 %v1605_v13, %v6045_v38 }
 0x141   : > { %v4964_v52 = vpop.f32.mrf.mxu1  ;;  %v5020_v35 = vpop.f32.mrf.mxu0  ;;  %5223 = vmatmul.mubr.msk.f32.gmra.mxu1 %vm246_vm1, %v3137_v8  ;;  %5279 = vmatmul.mubr.msk.f32.gmra.mxu0 %vm246_vm1, %v3567_v49 }
 0x142   : > { %v6290_v6 = vadd.f32 %v2035_v26, %v1784_v60  ;;  %v1787_v62 = vadd.f32 %v4964_v52, %v6052_v46  ;;  %5225 = vmatprep.mubr.msk.f32.mxu1 %vm246_vm1, %v3138_v41  ;;  %5281 = vmatprep.mubr.msk.f32.mxu0 %vm246_vm1, %v3568_v42  ;;  %v3143_v26 = vld [vmem:[%s5362_s23 + $0x12d] sm:$0xff]  ;;  %v3144_v60 = vld [vmem:[%s5362_s23 + $0x135] sm:$0xff] }
 0x143   : > { %v1615_v19 = vpop.f32.mrf.mxu1  ;;  %v2045_v38 = vpop.f32.mrf.mxu0  ;;  %v3573_v41 = vld [vmem:[%s5362_s23 + $0x12e] sm:$0xff]  ;;  %v3574_v52 = vld [vmem:[%s5362_s23 + $0x136] sm:$0xff] }
 0x144   : > { %v6299_v17 = vadd.f32 %v5020_v35, %v1787_v62  ;;  %v1786_v28 = vadd.f32 %v1615_v19, %v6057_v44 }
 0x145   : > { %v4967_v0 = vpop.f32.mrf.mxu1  ;;  %v5023_v46 = vpop.f32.mrf.mxu0  ;;  %5226 = vmatmul.mubr.msk.f32.gmra.mxu1 %vm246_vm1, %v3139_v14  ;;  %5282 = vmatmul.mubr.msk.f32.gmra.mxu0 %vm246_vm1, %v3569_v12 }
 0x146   : > { %v6304_v30 = vadd.f32 %v2045_v38, %v1786_v28  ;;  %v1789_v7 = vadd.f32 %v4967_v0, %v6064_v15  ;;  %5228 = vmatprep.mubr.msk.f32.mxu1 %vm246_vm1, %v3140_v21  ;;  %5284 = vmatprep.mubr.msk.f32.mxu0 %vm246_vm1, %v3570_v53  ;;  %v3145_v38 = vld [vmem:[%s5362_s23 + $0x13d] sm:$0xff] }
 0x147   : > { %v1625_v25 = vpop.f32.mrf.mxu1  ;;  %v2055_v44 = vpop.f32.mrf.mxu0  ;;  %v3575_v21 = vld [vmem:[%s5362_s23 + $0x13e] sm:$0xff] }
 0x148   : > { %v6313_v23 = vadd.f32 %v5023_v46, %v1789_v7  ;;  %v1788_v43 = vadd.f32 %v1625_v25, %v6069_v57 }
 0x149   : > { %v4970_v8 = vpop.f32.mrf.mxu1  ;;  %v5026_v15 = vpop.f32.mrf.mxu0  ;;  %5229 = vmatmul.mubr.msk.f32.gmra.mxu1 %vm246_vm1, %v3141_v20  ;;  %5285 = vmatmul.mubr.msk.f32.gmra.mxu0 %vm246_vm1, %v3571_v32 }
 0x14a   : > { %v6318_v49 = vadd.f32 %v2055_v44, %v1788_v43  ;;  %v1791_v13 = vadd.f32 %v4970_v8, %v6076_v31  ;;  %5231 = vmatprep.mubr.msk.f32.mxu1 %vm246_vm1, %v3142_v36  ;;  %5287 = vmatprep.mubr.msk.f32.mxu0 %vm246_vm1, %v3572_v1 }
 0x14b   : > { %v1635_v42 = vpop.f32.mrf.mxu1  ;;  %v2065_v57 = vpop.f32.mrf.mxu0 }
 0x14c   : > { %v6327_v35 = vadd.f32 %v5026_v15, %v1791_v13  ;;  %v1790_v62 = vadd.f32 %v1635_v42, %v6081_v50 }
 0x14d   : > { %v4973_v14 = vpop.f32.mrf.mxu1  ;;  %v5029_v12 = vpop.f32.mrf.mxu0  ;;  %5232 = vmatmul.mubr.msk.f32.gmra.mxu1 %vm246_vm1, %v3143_v26  ;;  %5288 = vmatmul.mubr.msk.f32.gmra.mxu0 %vm246_vm1, %v3573_v41 }
 0x14e   : > { %v6332_v31 = vadd.f32 %v2065_v57, %v1790_v62  ;;  %v1793_v19 = vadd.f32 %v4973_v14, %v6089_v55  ;;  %5234 = vmatprep.mubr.msk.f32.mxu1 %vm246_vm1, %v3144_v60  ;;  %5290 = vmatprep.mubr.msk.f32.mxu0 %vm246_vm1, %v3574_v52 }
 0x14f   : > { %v1645_v53 = vpop.f32.mrf.mxu1  ;;  %v2075_v28 = vpop.f32.mrf.mxu0 }
 0x150   : > { %v6339_v0 = vadd.f32 %v5029_v12, %v1793_v19  ;;  %v1792_v50 = vadd.f32 %v1645_v53, %v6094_v56 }
 0x151   : > { %v4976_v46 = vpop.f32.mrf.mxu1  ;;  %v5032_v7 = vpop.f32.mrf.mxu0  ;;  %5235 = vmatmul.mubr.msk.f32.gmra.mxu1 %vm246_vm1, %v3145_v38  ;;  %5291 = vmatmul.mubr.msk.f32.gmra.mxu0 %vm246_vm1, %v3575_v21 }
 0x152   : > { %v6344_v20 = vadd.f32 %v2075_v28, %v1792_v50  ;;  %v1795_v55 = vadd.f32 %v4976_v46, %v6103_v51 }
 0x153   : > { %v1655_v32 = vpop.f32.mrf.mxu1  ;;  %v2085_v25 = vpop.f32.mrf.mxu0 }
 0x154   : > { %v6347_v44 = vadd.f32 %v5032_v7, %v1795_v55  ;;  %v1794_v36 = vadd.f32 %v1655_v32, %v6108_v24 }
 0x155   : > { %v4979_v1 = vpop.f32.mrf.mxu1  ;;  %v5035_v43 = vpop.f32.mrf.mxu0 }
 0x156   : > { %v6350_v8 = vadd.f32 %v2085_v25, %v1794_v36  ;;  %v1797_v56 = vadd.f32 %v4979_v1, %v6117_v33 }
 0x157   : > { %v1665_v15 = vpop.f32.mrf.mxu1  ;;  %v2095_v13 = vpop.f32.mrf.mxu0 }
 0x158   : > { %v6353_v26 = vadd.f32 %v5035_v43, %v1797_v56  ;;  %v1796_v41 = vadd.f32 %v1665_v15, %v6122_v37 }
 0x159   : > { %v4982_v42 = vpop.f32.mrf.mxu1  ;;  %v5038_v51 = vpop.f32.mrf.mxu0 }
 0x15a   : > { %v6356_v57 = vadd.f32 %v2095_v13, %v1796_v41  ;;  %v1799_v60 = vadd.f32 %v4982_v42, %v6131_v47 }
 0x15b   : > { %v1675_v52 = vpop.f32.mrf.mxu1  ;;  %v2105_v24 = vpop.f32.mrf.mxu0 }
 0x15c   : > { %v6359_v62 = vadd.f32 %v5038_v51, %v1799_v60  ;;  %v1798_v14 = vadd.f32 %v1675_v52, %v6136_v2 }
 0x15d   : > { %v4985_v12 = vpop.f32.mrf.mxu1  ;;  %v5041_v33 = vpop.f32.mrf.mxu0 }
 0x15e   : > { %v6362_v19 = vadd.f32 %v2105_v24, %v1798_v14  ;;  %v1801_v38 = vadd.f32 %v4985_v12, %v6145_v4 }
 0x15f   : > { %v1685_v21 = vpop.f32.mrf.mxu1  ;;  %v2115_v37 = vpop.f32.mrf.mxu0 }
 0x160   : > { %v6365_v53 = vadd.f32 %v5041_v33, %v1801_v38  ;;  %v1800_v28 = vadd.f32 %v1685_v21, %v6150_v29 }
 0x161   : > { %v4988_v50 = vpop.f32.mrf.mxu1  ;;  %v5044_v47 = vpop.f32.mrf.mxu0 }
 0x162   : > { %v6368_v46 = vadd.f32 %v2115_v37, %v1800_v28  ;;  %v1803_v7 = vadd.f32 %v4988_v50, %v6159_v10 }
 0x163   : > { %v1695_v55 = vpop.f32.mrf.mxu1  ;;  %v2125_v2 = vpop.f32.mrf.mxu0 }
 0x164   : > { %v6371_v32 = vadd.f32 %v5044_v47, %v1803_v7  ;;  %v1802_v25 = vadd.f32 %v1695_v55, %v6164_v48 }
 0x165   : > { %v4991_v36 = vpop.f32.mrf.mxu1  ;;  %v5047_v4 = vpop.f32.mrf.mxu0 }
 0x166   : > { %v6374_v1 = vadd.f32 %v2125_v2, %v1802_v25  ;;  %v1805_v43 = vadd.f32 %v4991_v36, %v6173_v16 }
 0x167   : > { %v1705_v56 = vpop.f32.mrf.mxu1  ;;  %v2135_v29 = vpop.f32.mrf.mxu0 }
 0x168   : > { %v6377_v15 = vadd.f32 %v5047_v4, %v1805_v43  ;;  %v1804_v13 = vadd.f32 %v1705_v56, %v6178_v9 }
 0x169   : > { %v4994_v41 = vpop.f32.mrf.mxu1  ;;  %v5050_v10 = vpop.f32.mrf.mxu0 }
 0x16a   : > { %v6380_v42 = vadd.f32 %v2135_v29, %v1804_v13  ;;  %v1807_v51 = vadd.f32 %v4994_v41, %v6187_v22 }
 0x16b   : > { %v1715_v60 = vpop.f32.mrf.mxu1  ;;  %v2145_v48 = vpop.f32.mrf.mxu0 }
 0x16c   : > { %v6383_v52 = vadd.f32 %v5050_v10, %v1807_v51  ;;  %v1806_v24 = vadd.f32 %v1715_v60, %v6192_v63 }
 0x16d   : > { %v4997_v14 = vpop.f32.mrf.mxu1  ;;  %v5053_v16 = vpop.f32.mrf.mxu0 }
 0x16e   : > { %v6386_v12 = vadd.f32 %v2145_v48, %v1806_v24  ;;  %v1809_v33 = vadd.f32 %v4997_v14, %v6201_v39 }
 0x16f   : > { %v1725_v38 = vpop.f32.mrf.mxu1  ;;  %v2155_v9 = vpop.f32.mrf.mxu0 }
 0x170   : > { %v6389_v21 = vadd.f32 %v5053_v16, %v1809_v33  ;;  %v1808_v37 = vadd.f32 %v1725_v38, %v6206_v61 }
 0x171   : > { %v5000_v28 = vpop.f32.mrf.mxu1  ;;  %v5056_v22 = vpop.f32.mrf.mxu0 }
 0x172   : > { %v6392_v50 = vadd.f32 %v2155_v9, %v1808_v37  ;;  %v1811_v47 = vadd.f32 %v5000_v28, %v6215_v45 }
 0x173   : > { %v1735_v7 = vpop.f32.mrf.mxu1  ;;  %v2165_v63 = vpop.f32.mrf.mxu0 }
 0x174   : > { %v6395_v55 = vadd.f32 %v5056_v22, %v1811_v47  ;;  %v1810_v2 = vadd.f32 %v1735_v7, %v6220_v18 }
 0x175   : > { %v5003_v25 = vpop.f32.mrf.mxu1  ;;  %v5059_v39 = vpop.f32.mrf.mxu0 }
 0x176   : > { %v6398_v36 = vadd.f32 %v2165_v63, %v1810_v2  ;;  %v1813_v4 = vadd.f32 %v5003_v25, %v6229_v59 }
 0x177   : > { %v1745_v43 = vpop.f32.mrf.mxu1  ;;  %v2175_v61 = vpop.f32.mrf.mxu0 }
 0x178   : > { %v6401_v56 = vadd.f32 %v5059_v39, %v1813_v4  ;;  %v1812_v29 = vadd.f32 %v1745_v43, %v6234_v34 }
 0x179   : > { %v5006_v13 = vpop.f32.mrf.mxu1  ;;  %v5062_v45 = vpop.f32.mrf.mxu0 }
 0x17a   : > { %v6404_v41 = vadd.f32 %v2175_v61, %v1812_v29  ;;  %v1815_v10 = vadd.f32 %v5006_v13, %v6243_v3 }
 0x17b   : > { %v1755_v51 = vpop.f32.mrf.mxu1  ;;  %v2185_v18 = vpop.f32.mrf.mxu0 }
 0x17c   : > { %v6407_v60 = vadd.f32 %v5062_v45, %v1815_v10  ;;  %v1814_v48 = vadd.f32 %v1755_v51, %v6248_v54 }
 0x17d   : > { %v5009_v24 = vpop.f32.mrf.mxu1  ;;  %v5065_v59 = vpop.f32.mrf.mxu0 }
 0x17e   : > { %v6410_v14 = vadd.f32 %v2185_v18, %v1814_v48  ;;  %v1817_v16 = vadd.f32 %v5009_v24, %v6257_v58 }
 0x17f   : > { %v1765_v33 = vpop.f32.mrf.mxu1  ;;  %v2195_v34 = vpop.f32.mrf.mxu0 }
 0x180   : > { %v6413_v38 = vadd.f32 %v5065_v59, %v1817_v16  ;;  %v1816_v9 = vadd.f32 %v1765_v33, %v6262_v27 }
 0x181   : > { %v5012_v37 = vpop.f32.mrf.mxu1  ;;  %v5068_v3 = vpop.f32.mrf.mxu0 }
 0x182   : > { %v6416_v28 = vadd.f32 %v2195_v34, %v1816_v9  ;;  %v1819_v22 = vadd.f32 %v5012_v37, %v6271_v5 }
 0x183   : > { %v1775_v47 = vpop.f32.mrf.mxu1  ;;  %v2205_v54 = vpop.f32.mrf.mxu0 }
 0x184   : > { %v6419_v7 = vadd.f32 %v5068_v3, %v1819_v22  ;;  %v1818_v63 = vadd.f32 %v1775_v47, %v6276_v40 }
 0x185   : > { %v5073_v2 = vpop.f32.mrf.mxu1  ;;  %v5129_v58 = vpop.f32.mrf.mxu0 }
 0x186   : > { %v6422_v25 = vadd.f32 %v2205_v54, %v1818_v63  ;;  %v2645_v39 = vadd.f32 %v5073_v2, %v6285_v11 }
 0x187   : > { %v2465_v4 = vpop.f32.mrf.mxu1  ;;  %v2895_v27 = vpop.f32.mrf.mxu0 }
 0x188   : > { %v6425_v43 = vadd.f32 %v5129_v58, %v2645_v39  ;;  %v2644_v61 = vadd.f32 %v2465_v4, %v6290_v6 }
 0x189   : > { %v5076_v29 = vpop.f32.mrf.mxu1  ;;  %v5132_v5 = vpop.f32.mrf.mxu0 }
 0x18a   : > { %v6428_v13 = vadd.f32 %v2895_v27, %v2644_v61  ;;  %v2647_v45 = vadd.f32 %v5076_v29, %v6299_v17 }
 0x18b   : > { %v2475_v10 = vpop.f32.mrf.mxu1  ;;  %v2905_v40 = vpop.f32.mrf.mxu0 }
 0x18c   : > { %v6431_v51 = vadd.f32 %v5132_v5, %v2647_v45  ;;  %v2646_v18 = vadd.f32 %v2475_v10, %v6304_v30 }
 0x18d   : > { %v5079_v48 = vpop.f32.mrf.mxu1  ;;  %v5135_v11 = vpop.f32.mrf.mxu0 }
 0x18e   : > { %v6434_v24 = vadd.f32 %v2905_v40, %v2646_v18  ;;  %v2649_v59 = vadd.f32 %v5079_v48, %v6313_v23 }
 0x18f   : > { %v2485_v16 = vpop.f32.mrf.mxu1  ;;  %v2915_v6 = vpop.f32.mrf.mxu0 }
 0x190   : > { %v6437_v33 = vadd.f32 %v5135_v11, %v2649_v59  ;;  %v2648_v34 = vadd.f32 %v2485_v16, %v6318_v49 }
 0x191   : > { %v5082_v9 = vpop.f32.mrf.mxu1  ;;  %v5138_v17 = vpop.f32.mrf.mxu0 }
 0x192   : > { %v6440_v37 = vadd.f32 %v2915_v6, %v2648_v34  ;;  %v2651_v3 = vadd.f32 %v5082_v9, %v6327_v35 }
 0x193   : > { %v2495_v22 = vpop.f32.mrf.mxu1  ;;  %v2925_v30 = vpop.f32.mrf.mxu0 }
 0x194   : > { %v6443_v47 = vadd.f32 %v5138_v17, %v2651_v3  ;;  %v2650_v54 = vadd.f32 %v2495_v22, %v6332_v31 }
 0x195   : > { %v5085_v63 = vpop.f32.mrf.mxu1  ;;  %v5141_v23 = vpop.f32.mrf.mxu0 }
 0x196   : > { %v6446_v2 = vadd.f32 %v2925_v30, %v2650_v54  ;;  %v2653_v58 = vadd.f32 %v5085_v63, %v6339_v0 }
 0x197   : > { %v2505_v39 = vpop.f32.mrf.mxu1  ;;  %v2935_v49 = vpop.f32.mrf.mxu0 }
 0x198   : > { %v6449_v4 = vadd.f32 %v5141_v23, %v2653_v58  ;;  %v2652_v27 = vadd.f32 %v2505_v39, %v6344_v20 }
 0x199   : > { %v5088_v61 = vpop.f32.mrf.mxu1  ;;  %v5144_v35 = vpop.f32.mrf.mxu0 }
 0x19a   : > { %v6452_v29 = vadd.f32 %v2935_v49, %v2652_v27  ;;  %v2655_v5 = vadd.f32 %v5088_v61, %v6347_v44 }
 0x19b   : > { %v2515_v45 = vpop.f32.mrf.mxu1  ;;  %v2945_v31 = vpop.f32.mrf.mxu0 }
 0x19c   : > { %v6455_v10 = vadd.f32 %v5144_v35, %v2655_v5  ;;  %v2654_v40 = vadd.f32 %v2515_v45, %v6350_v8 }
 0x19d   : > { %v5091_v18 = vpop.f32.mrf.mxu1  ;;  %v5147_v0 = vpop.f32.mrf.mxu0 }
 0x19e   : > { %v6458_v48 = vadd.f32 %v2945_v31, %v2654_v40  ;;  %v2657_v11 = vadd.f32 %v5091_v18, %v6353_v26 }
 0x19f   : > { %v2525_v59 = vpop.f32.mrf.mxu1  ;;  %v2955_v20 = vpop.f32.mrf.mxu0 }
 0x1a0   : > { %v6461_v16 = vadd.f32 %v5147_v0, %v2657_v11  ;;  %v2656_v6 = vadd.f32 %v2525_v59, %v6356_v57 }
 0x1a1   : > { %v5094_v34 = vpop.f32.mrf.mxu1  ;;  %v5150_v44 = vpop.f32.mrf.mxu0 }
 0x1a2   : > { %v6464_v9 = vadd.f32 %v2955_v20, %v2656_v6  ;;  %v2659_v17 = vadd.f32 %v5094_v34, %v6359_v62 }
 0x1a3   : > { %v2535_v3 = vpop.f32.mrf.mxu1  ;;  %v2965_v8 = vpop.f32.mrf.mxu0 }
 0x1a4   : > { %v6467_v22 = vadd.f32 %v5150_v44, %v2659_v17  ;;  %v2658_v30 = vadd.f32 %v2535_v3, %v6362_v19 }
 0x1a5   : > { %v5097_v54 = vpop.f32.mrf.mxu1  ;;  %v5153_v26 = vpop.f32.mrf.mxu0 }
 0x1a6   : > { %v6470_v63 = vadd.f32 %v2965_v8, %v2658_v30  ;;  %v2661_v23 = vadd.f32 %v5097_v54, %v6365_v53 }
 0x1a7   : > { %v2545_v58 = vpop.f32.mrf.mxu1  ;;  %v2975_v57 = vpop.f32.mrf.mxu0 }
 0x1a8   : > { %v6473_v39 = vadd.f32 %v5153_v26, %v2661_v23  ;;  %v2660_v49 = vadd.f32 %v2545_v58, %v6368_v46 }
 0x1a9   : > { %v5100_v27 = vpop.f32.mrf.mxu1  ;;  %v5156_v62 = vpop.f32.mrf.mxu0 }
 0x1aa   : > { %v6476_v61 = vadd.f32 %v2975_v57, %v2660_v49  ;;  %v2663_v35 = vadd.f32 %v5100_v27, %v6371_v32 }
 0x1ab   : > { %v2555_v5 = vpop.f32.mrf.mxu1  ;;  %v2985_v19 = vpop.f32.mrf.mxu0 }
 0x1ac   : > { %v6479_v45 = vadd.f32 %v5156_v62, %v2663_v35  ;;  %v2662_v31 = vadd.f32 %v2555_v5, %v6374_v1 }
 0x1ad   : > { %v5103_v40 = vpop.f32.mrf.mxu1  ;;  %v5159_v53 = vpop.f32.mrf.mxu0 }
 0x1ae   : > { %v6482_v18 = vadd.f32 %v2985_v19, %v2662_v31  ;;  %v2665_v0 = vadd.f32 %v5103_v40, %v6377_v15 }
 0x1af   : > { %v2565_v11 = vpop.f32.mrf.mxu1  ;;  %v2995_v46 = vpop.f32.mrf.mxu0 }
 0x1b0   : > { %v6485_v59 = vadd.f32 %v5159_v53, %v2665_v0  ;;  %v2664_v20 = vadd.f32 %v2565_v11, %v6380_v42 }
 0x1b1   : > { %v5106_v6 = vpop.f32.mrf.mxu1  ;;  %v5162_v32 = vpop.f32.mrf.mxu0 }
 0x1b2   : > { %v6488_v34 = vadd.f32 %v2995_v46, %v2664_v20  ;;  %v2667_v44 = vadd.f32 %v5106_v6, %v6383_v52 }
 0x1b3   : > { %v2575_v17 = vpop.f32.mrf.mxu1  ;;  %v3005_v1 = vpop.f32.mrf.mxu0 }
 0x1b4   : > { %v6491_v3 = vadd.f32 %v5162_v32, %v2667_v44  ;;  %v2666_v8 = vadd.f32 %v2575_v17, %v6386_v12 }
 0x1b5   : > { %v5109_v30 = vpop.f32.mrf.mxu1  ;;  %v5165_v15 = vpop.f32.mrf.mxu0 }
 0x1b6   : > { %v6494_v54 = vadd.f32 %v3005_v1, %v2666_v8  ;;  %v2669_v26 = vadd.f32 %v5109_v30, %v6389_v21 }
 0x1b7   : > { %v2585_v23 = vpop.f32.mrf.mxu1  ;;  %v3015_v42 = vpop.f32.mrf.mxu0 }
 0x1b8   : > { %v6497_v58 = vadd.f32 %v5165_v15, %v2669_v26  ;;  %v2668_v57 = vadd.f32 %v2585_v23, %v6392_v50 }
 0x1b9   : > { %v5112_v49 = vpop.f32.mrf.mxu1  ;;  %v5168_v52 = vpop.f32.mrf.mxu0 }
 0x1ba   : > { %v6500_v27 = vadd.f32 %v3015_v42, %v2668_v57  ;;  %v2671_v62 = vadd.f32 %v5112_v49, %v6395_v55 }
 0x1bb   : > { %v2595_v35 = vpop.f32.mrf.mxu1  ;;  %v3025_v12 = vpop.f32.mrf.mxu0 }
 0x1bc   : > { %v6503_v5 = vadd.f32 %v5168_v52, %v2671_v62  ;;  %v2670_v19 = vadd.f32 %v2595_v35, %v6398_v36 }
 0x1bd   : > { %v5115_v31 = vpop.f32.mrf.mxu1  ;;  %v5171_v21 = vpop.f32.mrf.mxu0 }
 0x1be   : > { %v6506_v40 = vadd.f32 %v3025_v12, %v2670_v19  ;;  %v2673_v53 = vadd.f32 %v5115_v31, %v6401_v56 }
 0x1bf   : > { %v2605_v0 = vpop.f32.mrf.mxu1  ;;  %v3035_v50 = vpop.f32.mrf.mxu0 }
 0x1c0   : > { %v6509_v11 = vadd.f32 %v5171_v21, %v2673_v53  ;;  %v2672_v46 = vadd.f32 %v2605_v0, %v6404_v41 }
 0x1c1   : > { %v5118_v20 = vpop.f32.mrf.mxu1  ;;  %v5174_v55 = vpop.f32.mrf.mxu0 }
 0x1c2   : > { %v6512_v6 = vadd.f32 %v3035_v50, %v2672_v46  ;;  %v2675_v32 = vadd.f32 %v5118_v20, %v6407_v60 }
 0x1c3   : > { %v2615_v44 = vpop.f32.mrf.mxu1  ;;  %v3045_v36 = vpop.f32.mrf.mxu0 }
 0x1c4   : > { %v6515_v17 = vadd.f32 %v5174_v55, %v2675_v32  ;;  %v2674_v1 = vadd.f32 %v2615_v44, %v6410_v14 }
 0x1c5   : > { %v5121_v8 = vpop.f32.mrf.mxu1  ;;  %v5177_v56 = vpop.f32.mrf.mxu0 }
 0x1c6   : > { %v6518_v30 = vadd.f32 %v3045_v36, %v2674_v1  ;;  %v2677_v15 = vadd.f32 %v5121_v8, %v6413_v38 }
 0x1c7   : > { %v2625_v41 = vpop.f32.mrf.mxu1  ;;  %v3055_v26 = vpop.f32.mrf.mxu0 }
 0x1c8   : > { %v6521_v23 = vadd.f32 %v5177_v56, %v2677_v15  ;;  %v2676_v42 = vadd.f32 %v2625_v41, %v6416_v28  ;;  %v6537_v28 = vld [vmem:[%s6692_s2] ss:$0 sm:$0xff] }
 0x1c9   : > { %v5124_v60 = vpop.f32.mrf.mxu1  ;;  %v5180_v57 = vpop.f32.mrf.mxu0 }
 0x1ca   : > { %v6524_v49 = vadd.f32 %v3055_v26, %v2676_v42  ;;  %v2679_v52 = vadd.f32 %v5124_v60, %v6419_v7 }
 0x1cb   : > { %v2635_v14 = vpop.f32.mrf.mxu1  ;;  %v3065_v62 = vpop.f32.mrf.mxu0 }
 0x1cc   : > { %v6527_v35 = vadd.f32 %v5180_v57, %v2679_v52  ;;  %v2678_v12 = vadd.f32 %v2635_v14, %v6422_v25 }
 0x1cd   : > { %v5185_v19 = vpop.f32.mrf.mxu1  ;;  %v5241_v38 = vpop.f32.mrf.mxu0 }
 0x1ce   : > { %v6531_v31 = vadd.f32 %v3065_v62, %v2678_v12  ;;  %v3505_v21 = vadd.f32 %v5185_v19, %v6425_v43 }
 0x1cf   : > { %v3325_v53 = vpop.f32.mrf.mxu1  ;;  %v3755_v7 = vpop.f32.mrf.mxu0 }
 0x1d0   : > { %v3935_v0 = vadd.f32 %v5241_v38, %v3505_v21  ;;  %v3504_v50 = vadd.f32 %v3325_v53, %v6428_v13 }
 0x1d1   : > { %v5188_v25 = vpop.f32.mrf.mxu1  ;;  %v5244_v43 = vpop.f32.mrf.mxu0 }
 0x1d2   : > { %v3978_v46 = vadd.f32 %v6537_v28, %v3935_v0  ;;  %v3934_v20 = vadd.f32 %v3755_v7, %v3504_v50  ;;  %v3507_v55 = vadd.f32 %v5188_v25, %v6431_v51 }
 0x1d3   : > { %v3335_v32 = vpop.f32.mrf.mxu1  ;;  %v3765_v44 = vpop.f32.mrf.mxu0 }
 0x1d4   : > { %4015 = vst.msk [vmem:[%s6543_s16 + $0x8] sm:$0xff] %vm4013_vm2, %v3978_v46  ;;  %v3977_v13 = vadd.f32 %v6537_v28, %v3934_v20  ;;  %v3937_v36 = vadd.f32 %v5244_v43, %v3507_v55  ;;  %v3506_v1 = vadd.f32 %v3335_v32, %v6434_v24 }
 0x1d5   : > { %v5191_v8 = vpop.f32.mrf.mxu1  ;;  %v5247_v56 = vpop.f32.mrf.mxu0 }
 0x1d6   : > { %4014 = vst.msk [vmem:[%s6543_s16] sm:$0xff] %vm4013_vm2, %v3977_v13  ;;  %v3980_v15 = vadd.f32 %v6537_v28, %v3937_v36  ;;  %v3936_v41 = vadd.f32 %v3765_v44, %v3506_v1  ;;  %v3509_v51 = vadd.f32 %v5191_v8, %v6437_v33 }
 0x1d7   : > { %v3345_v26 = vpop.f32.mrf.mxu1  ;;  %v3775_v42 = vpop.f32.mrf.mxu0 }
 0x1d8   : > { %4017 = vst.msk [vmem:[%s6543_s16 + $0x18] sm:$0xff] %vm4013_vm2, %v3980_v15  ;;  %v3979_v60 = vadd.f32 %v6537_v28, %v3936_v41  ;;  %v3939_v57 = vadd.f32 %v5247_v56, %v3509_v51  ;;  %v3508_v24 = vadd.f32 %v3345_v26, %v6440_v37 }
 0x1d9   : > { %v5194_v52 = vpop.f32.mrf.mxu1  ;;  %v5250_v14 = vpop.f32.mrf.mxu0 }
 0x1da   : > { %4016 = vst.msk [vmem:[%s6543_s16 + $0x10] sm:$0xff] %vm4013_vm2, %v3979_v60  ;;  %v3982_v62 = vadd.f32 %v6537_v28, %v3939_v57  ;;  %v3938_v12 = vadd.f32 %v3775_v42, %v3508_v24  ;;  %v3511_v33 = vadd.f32 %v5194_v52, %v6443_v47 }
 0x1db   : > { %v3355_v19 = vpop.f32.mrf.mxu1  ;;  %v3785_v38 = vpop.f32.mrf.mxu0 }
 0x1dc   : > { %4019 = vst.msk [vmem:[%s6543_s16 + $0x28] sm:$0xff] %vm4013_vm2, %v3982_v62  ;;  %v3981_v21 = vadd.f32 %v6537_v28, %v3938_v12  ;;  %v3941_v53 = vadd.f32 %v5250_v14, %v3511_v33  ;;  %v3510_v37 = vadd.f32 %v3355_v19, %v6446_v2 }
 0x1dd   : > { %v5197_v7 = vpop.f32.mrf.mxu1  ;;  %v5253_v0 = vpop.f32.mrf.mxu0 }
 0x1de   : > { %4018 = vst.msk [vmem:[%s6543_s16 + $0x20] sm:$0xff] %vm4013_vm2, %v3981_v21  ;;  %v3984_v50 = vadd.f32 %v6537_v28, %v3941_v53  ;;  %v3940_v25 = vadd.f32 %v3785_v38, %v3510_v37  ;;  %v3513_v47 = vadd.f32 %v5197_v7, %v6449_v4 }
 0x1df   : > { %v3365_v43 = vpop.f32.mrf.mxu1  ;;  %v3795_v46 = vpop.f32.mrf.mxu0 }
 0x1e0   : > { %4021 = vst.msk [vmem:[%s6543_s16 + $0x38] sm:$0xff] %vm4013_vm2, %v3984_v50  ;;  %v3983_v20 = vadd.f32 %v6537_v28, %v3940_v25  ;;  %v3943_v55 = vadd.f32 %v5253_v0, %v3513_v47  ;;  %v3512_v2 = vadd.f32 %v3365_v43, %v6452_v29 }
 0x1e1   : > { %v5200_v32 = vpop.f32.mrf.mxu1  ;;  %v5256_v44 = vpop.f32.mrf.mxu0 }
 0x1e2   : > { %4020 = vst.msk [vmem:[%s6543_s16 + $0x30] sm:$0xff] %vm4013_vm2, %v3983_v20  ;;  %v3986_v13 = vadd.f32 %v6537_v28, %v3943_v55  ;;  %v3942_v36 = vadd.f32 %v3795_v46, %v3512_v2  ;;  %v3515_v4 = vadd.f32 %v5200_v32, %v6455_v10 }
 0x1e3   : > { %v3375_v1 = vpop.f32.mrf.mxu1  ;;  %v3805_v8 = vpop.f32.mrf.mxu0 }
 0x1e4   : > { %4023 = vst.msk [vmem:[%s6543_s16 + $0x48] sm:$0xff] %vm4013_vm2, %v3986_v13  ;;  %v3985_v56 = vadd.f32 %v6537_v28, %v3942_v36  ;;  %v3945_v15 = vadd.f32 %v5256_v44, %v3515_v4  ;;  %v3514_v29 = vadd.f32 %v3375_v1, %v6458_v48 }
 0x1e5   : > { %v5203_v41 = vpop.f32.mrf.mxu1  ;;  %v5259_v51 = vpop.f32.mrf.mxu0 }
 0x1e6   : > { %4022 = vst.msk [vmem:[%s6543_s16 + $0x40] sm:$0xff] %vm4013_vm2, %v3985_v56  ;;  %v3988_v26 = vadd.f32 %v6537_v28, %v3945_v15  ;;  %v3944_v42 = vadd.f32 %v3805_v8, %v3514_v29  ;;  %v3517_v10 = vadd.f32 %v5203_v41, %v6461_v16 }
 0x1e7   : > { %v3385_v60 = vpop.f32.mrf.mxu1  ;;  %v3815_v57 = vpop.f32.mrf.mxu0 }
 0x1e8   : > { %4025 = vst.msk [vmem:[%s6543_s16 + $0x58] sm:$0xff] %vm4013_vm2, %v3988_v26  ;;  %v3987_v24 = vadd.f32 %v6537_v28, %v3944_v42  ;;  %v3947_v52 = vadd.f32 %v5259_v51, %v3517_v10  ;;  %v3516_v48 = vadd.f32 %v3385_v60, %v6464_v9 }
 0x1e9   : > { %v5206_v14 = vpop.f32.mrf.mxu1  ;;  %v5262_v62 = vpop.f32.mrf.mxu0 }
 0x1ea   : > { %4024 = vst.msk [vmem:[%s6543_s16 + $0x50] sm:$0xff] %vm4013_vm2, %v3987_v24  ;;  %v3990_v12 = vadd.f32 %v6537_v28, %v3947_v52  ;;  %v3946_v33 = vadd.f32 %v3815_v57, %v3516_v48  ;;  %v3519_v16 = vadd.f32 %v5206_v14, %v6467_v22 }
 0x1eb   : > { %v3395_v19 = vpop.f32.mrf.mxu1  ;;  %v3825_v38 = vpop.f32.mrf.mxu0 }
 0x1ec   : > { %4027 = vst.msk [vmem:[%s6543_s16 + $0x68] sm:$0xff] %vm4013_vm2, %v3990_v12  ;;  %v3989_v21 = vadd.f32 %v6537_v28, %v3946_v33  ;;  %v3949_v53 = vadd.f32 %v5262_v62, %v3519_v16  ;;  %v3518_v9 = vadd.f32 %v3395_v19, %v6470_v63 }
 0x1ed   : > { %v5209_v37 = vpop.f32.mrf.mxu1  ;;  %v5265_v7 = vpop.f32.mrf.mxu0 }
 0x1ee   : > { %4026 = vst.msk [vmem:[%s6543_s16 + $0x60] sm:$0xff] %vm4013_vm2, %v3989_v21  ;;  %v3992_v0 = vadd.f32 %v6537_v28, %v3949_v53  ;;  %v3948_v50 = vadd.f32 %v3825_v38, %v3518_v9  ;;  %v3521_v22 = vadd.f32 %v5209_v37, %v6473_v39 }
 0x1ef   : > { %v3405_v25 = vpop.f32.mrf.mxu1  ;;  %v3835_v47 = vpop.f32.mrf.mxu0 }
 0x1f0   : > { %4029 = vst.msk [vmem:[%s6543_s16 + $0x78] sm:$0xff] %vm4013_vm2, %v3992_v0  ;;  %v3991_v43 = vadd.f32 %v6537_v28, %v3948_v50  ;;  %v3951_v46 = vadd.f32 %v5265_v7, %v3521_v22  ;;  %v3520_v63 = vadd.f32 %v3405_v25, %v6476_v61 }
 0x1f1   : > { %v5212_v20 = vpop.f32.mrf.mxu1  ;;  %v5268_v55 = vpop.f32.mrf.mxu0 }
 0x1f2   : > { %4028 = vst.msk [vmem:[%s6543_s16 + $0x70] sm:$0xff] %vm4013_vm2, %v3991_v43  ;;  %v3994_v2 = vadd.f32 %v6537_v28, %v3951_v46  ;;  %v3950_v32 = vadd.f32 %v3835_v47, %v3520_v63  ;;  %v3523_v39 = vadd.f32 %v5212_v20, %v6479_v45 }
 0x1f3   : > { %v3415_v44 = vpop.f32.mrf.mxu1  ;;  %v3845_v13 = vpop.f32.mrf.mxu0 }
 0x1f4   : > { %4031 = vst.msk [vmem:[%s6543_s16 + $0x88] sm:$0xff] %vm4013_vm2, %v3994_v2  ;;  %v3993_v36 = vadd.f32 %v6537_v28, %v3950_v32  ;;  %v3953_v4 = vadd.f32 %v5268_v55, %v3523_v39  ;;  %v3522_v61 = vadd.f32 %v3415_v44, %v6482_v18 }
 0x1f5   : > { %v5215_v1 = vpop.f32.mrf.mxu1  ;;  %v5271_v8 = vpop.f32.mrf.mxu0 }
 0x1f6   : > { %4030 = vst.msk [vmem:[%s6543_s16 + $0x80] sm:$0xff] %vm4013_vm2, %v3993_v36  ;;  %v3996_v56 = vadd.f32 %v6537_v28, %v3953_v4  ;;  %v3952_v15 = vadd.f32 %v3845_v13, %v3522_v61  ;;  %v3525_v45 = vadd.f32 %v5215_v1, %v6485_v59 }
 0x1f7   : > { %v3425_v29 = vpop.f32.mrf.mxu1  ;;  %v3855_v41 = vpop.f32.mrf.mxu0 }
 0x1f8   : > { %4033 = vst.msk [vmem:[%s6543_s16 + $0x98] sm:$0xff] %vm4013_vm2, %v3996_v56  ;;  %v3995_v51 = vadd.f32 %v6537_v28, %v3952_v15  ;;  %v3955_v26 = vadd.f32 %v5271_v8, %v3525_v45  ;;  %v3524_v18 = vadd.f32 %v3425_v29, %v6488_v34 }
 0x1f9   : > { %v5218_v42 = vpop.f32.mrf.mxu1  ;;  %v5274_v10 = vpop.f32.mrf.mxu0 }
 0x1fa   : > { %4032 = vst.msk [vmem:[%s6543_s16 + $0x90] sm:$0xff] %vm4013_vm2, %v3995_v51  ;;  %v3998_v60 = vadd.f32 %v6537_v28, %v3955_v26  ;;  %v3954_v57 = vadd.f32 %v3855_v41, %v3524_v18  ;;  %v3527_v59 = vadd.f32 %v5218_v42, %v6491_v3 }
 0x1fb   : > { %v3435_v24 = vpop.f32.mrf.mxu1  ;;  %v3865_v52 = vpop.f32.mrf.mxu0 }
 0x1fc   : > { %4035 = vst.msk [vmem:[%s6543_s16 + $0xa8] sm:$0xff] %vm4013_vm2, %v3998_v60  ;;  %v3997_v48 = vadd.f32 %v6537_v28, %v3954_v57  ;;  %v3957_v14 = vadd.f32 %v5274_v10, %v3527_v59  ;;  %v3526_v34 = vadd.f32 %v3435_v24, %v6494_v54 }
 0x1fd   : > { %v5221_v62 = vpop.f32.mrf.mxu1  ;;  %v5277_v12 = vpop.f32.mrf.mxu0 }
 0x1fe   : > { %4034 = vst.msk [vmem:[%s6543_s16 + $0xa0] sm:$0xff] %vm4013_vm2, %v3997_v48  ;;  %v4000_v33 = vadd.f32 %v6537_v28, %v3957_v14  ;;  %v3956_v16 = vadd.f32 %v3865_v52, %v3526_v34  ;;  %v3529_v3 = vadd.f32 %v5221_v62, %v6497_v58 }
 0x1ff   : > { %v3445_v19 = vpop.f32.mrf.mxu1  ;;  %v3875_v38 = vpop.f32.mrf.mxu0 }
 0x200   : > { %4037 = vst.msk [vmem:[%s6543_s16 + $0xb8] sm:$0xff] %vm4013_vm2, %v4000_v33  ;;  %v3999_v21 = vadd.f32 %v6537_v28, %v3956_v16  ;;  %v3959_v53 = vadd.f32 %v5277_v12, %v3529_v3  ;;  %v3528_v54 = vadd.f32 %v3445_v19, %v6500_v27 }
 0x201   : > { %v5224_v9 = vpop.f32.mrf.mxu1  ;;  %v5280_v37 = vpop.f32.mrf.mxu0 }
 0x202   : > { %4036 = vst.msk [vmem:[%s6543_s16 + $0xb0] sm:$0xff] %vm4013_vm2, %v3999_v21  ;;  %v4002_v7 = vadd.f32 %v6537_v28, %v3959_v53  ;;  %v3958_v0 = vadd.f32 %v3875_v38, %v3528_v54  ;;  %v3531_v58 = vadd.f32 %v5224_v9, %v6503_v5 }
 0x203   : > { %v3455_v50 = vpop.f32.mrf.mxu1  ;;  %v3885_v22 = vpop.f32.mrf.mxu0 }
 0x204   : > { %4039 = vst.msk [vmem:[%s6543_s16 + $0xc8] sm:$0xff] %vm4013_vm2, %v4002_v7  ;;  %v4001_v25 = vadd.f32 %v6537_v28, %v3958_v0  ;;  %v3961_v47 = vadd.f32 %v5280_v37, %v3531_v58  ;;  %v3530_v27 = vadd.f32 %v3455_v50, %v6506_v40 }
 0x205   : > { %v5227_v43 = vpop.f32.mrf.mxu1  ;;  %v5283_v46 = vpop.f32.mrf.mxu0 }
 0x206   : > { %4038 = vst.msk [vmem:[%s6543_s16 + $0xc0] sm:$0xff] %vm4013_vm2, %v4001_v25  ;;  %v4004_v63 = vadd.f32 %v6537_v28, %v3961_v47  ;;  %v3960_v20 = vadd.f32 %v3885_v22, %v3530_v27  ;;  %v3533_v5 = vadd.f32 %v5227_v43, %v6509_v11 }
 0x207   : > { %v3465_v55 = vpop.f32.mrf.mxu1  ;;  %v3895_v2 = vpop.f32.mrf.mxu0 }
 0x208   : > { %4041 = vst.msk [vmem:[%s6543_s16 + $0xd8] sm:$0xff] %vm4013_vm2, %v4004_v63  ;;  %v4003_v32 = vadd.f32 %v6537_v28, %v3960_v20  ;;  %v3963_v39 = vadd.f32 %v5283_v46, %v3533_v5  ;;  %v3532_v40 = vadd.f32 %v3465_v55, %v6512_v6 }
 0x209   : > { %v5230_v44 = vpop.f32.mrf.mxu1  ;;  %v5286_v13 = vpop.f32.mrf.mxu0 }
 0x20a   : > { %4040 = vst.msk [vmem:[%s6543_s16 + $0xd0] sm:$0xff] %vm4013_vm2, %v4003_v32  ;;  %v4006_v36 = vadd.f32 %v6537_v28, %v3963_v39  ;;  %v3962_v4 = vadd.f32 %v3895_v2, %v3532_v40  ;;  %v3535_v11 = vadd.f32 %v5230_v44, %v6515_v17 }
 0x20b   : > { %v3475_v61 = vpop.f32.mrf.mxu1  ;;  %v3905_v1 = vpop.f32.mrf.mxu0 }
 0x20c   : > { %4043 = vst.msk [vmem:[%s6543_s16 + $0xe8] sm:$0xff] %vm4013_vm2, %v4006_v36  ;;  %v4005_v8 = vadd.f32 %v6537_v28, %v3962_v4  ;;  %v3965_v56 = vadd.f32 %v5286_v13, %v3535_v11  ;;  %v3534_v6 = vadd.f32 %v3475_v61, %v6518_v30 }
 0x20d   : > { %v5233_v15 = vpop.f32.mrf.mxu1  ;;  %v5289_v45 = vpop.f32.mrf.mxu0 }
 0x20e   : > { %4042 = vst.msk [vmem:[%s6543_s16 + $0xe0] sm:$0xff] %vm4013_vm2, %v4005_v8  ;;  %v4008_v29 = vadd.f32 %v6537_v28, %v3965_v56  ;;  %v3964_v41 = vadd.f32 %v3905_v1, %v3534_v6  ;;  %v3537_v17 = vadd.f32 %v5233_v15, %v6521_v23 }
 0x20f   : > { %v3485_v51 = vpop.f32.mrf.mxu1  ;;  %v3915_v26 = vpop.f32.mrf.mxu0 }
 0x210   : > { %4045 = vst.msk [vmem:[%s6543_s16 + $0xf8] sm:$0xff] %vm4013_vm2, %v4008_v29  ;;  %v4007_v18 = vadd.f32 %v6537_v28, %v3964_v41  ;;  %v3967_v42 = vadd.f32 %v5289_v45, %v3537_v17  ;;  %v3536_v30 = vadd.f32 %v3485_v51, %v6524_v49 }
 0x211   : > { %v5236_v10 = vpop.f32.mrf.mxu1  ;;  %v5292_v60 = vpop.f32.mrf.mxu0 }
 0x212   : > { %4044 = vst.msk [vmem:[%s6543_s16 + $0xf0] sm:$0xff] %vm4013_vm2, %v4007_v18  ;;  %v4010_v57 = vadd.f32 %v6537_v28, %v3967_v42  ;;  %v3966_v59 = vadd.f32 %v3915_v26, %v3536_v30  ;;  %v3539_v23 = vadd.f32 %v5236_v10, %v6527_v35 }
 0x213   : > { %v3495_v24 = vpop.f32.mrf.mxu1  ;;  %v3925_v49 = vpop.f32.mrf.mxu0 }
 0x214   : > { %4047 = vst.msk [vmem:[%s6543_s16 + $0x108] sm:$0xff] %vm4013_vm2, %v4010_v57  ;;  %v4009_v52 = vadd.f32 %v6537_v28, %v3966_v59  ;;  %v3969_v48 = vadd.f32 %v5292_v60, %v3539_v23  ;;  %v3538_v14 = vadd.f32 %v3495_v24, %v6531_v31 }
 0x216   : > { %4046 = vst.msk [vmem:[%s6543_s16 + $0x100] sm:$0xff] %vm4013_vm2, %v4009_v52  ;;  %v4012_v34 = vadd.f32 %v6537_v28, %v3969_v48  ;;  %v3968_v62 = vadd.f32 %v3925_v49, %v3538_v14 }
 0x218   : > { %4049 = vst.msk [vmem:[%s6543_s16 + $0x118] sm:$0xff] %vm4013_vm2, %v4012_v34  ;;  %v4011_v12 = vadd.f32 %v6537_v28, %v3968_v62 }
 0x21a   : > { %4048 = vst.msk [vmem:[%s6543_s16 + $0x110] sm:$0xff] %vm4013_vm2, %v4011_v12 }
 0x21b PF: > { %s13_s12 = sadd.s32 1, %s5311_s12  }
 0x21c   : > { %p10_p4 = scmp.ge.s32.totalorder %s13_s12, 4  }
 0x21e   :  { %12 = sbr.rel (!%p10_p4) target bundleno = 1 (0x1), region = 70 }

</bundles_post_ra>
